<compile_context>
chip_gen: v5e
topology: v5e:2x2
jax: 0.10.0
libtpu: 0.0.40
codegen_flags: <defaults>
</compile_context>

<pallas_src>
import jax
import jax.numpy as jnp
from jax.experimental import pallas as pl
from jax.experimental.pallas import tpu as pltpu


def _round_up(x, m):
    return ((x + m - 1) // m) * m


def sine_layer_kernel(x_ref, w_ref, b_ref, s_ref, o_ref):
    # x_ref: (tn, K), w_ref: (K, Mp) = omega_0*W^T, b_ref: (1, Mp) = omega_0*b,
    # s_ref: (1, Mp), o_ref: (tn, Mp).
    # MXU matmul with f32 accumulation; bias add, sin and per-feature scale in
    # f32 on the VPU/EUP (co-issues under the MXU; keeps v5e happy — no bf16
    # VALU there).  shift() == 0.0 in the reference module.
    z = jnp.dot(x_ref[...], w_ref[...], preferred_element_type=jnp.float32)
    z = z + b_ref[...]
    o_ref[...] = (s_ref[...] * jnp.sin(z)).astype(o_ref.dtype)


def sine_layer_forward(x, w_t, b, scale_vec, *, omega_0=30.0, tile_n=2048,
                       out_dtype=jnp.float32,
                       vmem_budget_bytes=40 * 1024 * 1024):
    """SIREN layer forward.

    x: (N, K) f32 or bf16, w_t: (K, M) (pre-transposed weight),
    b: (M,), scale_vec: (M,).  Returns (N, M) in `out_dtype`.

    For bandwidth savings on v6e/v7x, pass x (and w_t) already in bf16 from
    the producer — the wrapper never casts activations itself.
    """
    N, K = x.shape
    Kw, M = w_t.shape
    assert Kw == K

    # ---- Parameter prep (tiny one-time ops) ---------------------------------
    # Fold omega_0 into the weights/bias so the kernel epilogue skips a mul.
    wp = (w_t.astype(jnp.float32) * omega_0).astype(w_t.dtype)
    bp = (b.astype(jnp.float32) * omega_0).reshape(1, M)
    sp = scale_vec.astype(jnp.float32).reshape(1, M)

    # Features: lane-dense output needs M % 128 == 0; pad only the (tiny)
    # params when M is genuinely ragged (real SIREN widths 128/256/512 aren't).
    m_pad = _round_up(M, 128)
    if m_pad != M:
        wp = jnp.pad(wp, ((0, 0), (0, m_pad - M)))
        bp = jnp.pad(bp, ((0, 0), (0, m_pad - M)))
        sp = jnp.pad(sp, ((0, 0), (0, m_pad - M)))

    # ---- Tiling (memory-bound: size each step to >= 1-2 MB of HBM traffic) --
    x_item = jnp.dtype(x.dtype).itemsize
    o_item = jnp.dtype(out_dtype).itemsize
    w_item = jnp.dtype(wp.dtype).itemsize
    row_align = 16 if x_item < 4 else 8          # bf16 packs (16,128) / vreg

    resident_bytes = K * m_pad * w_item + 2 * m_pad * 4     # W', b', scale
    per_row_bytes = 2 * (K * x_item + m_pad * o_item)       # double-buffered
    budget = vmem_budget_bytes - resident_bytes - (2 << 20) # misc headroom
    max_rows_by_vmem = max(row_align, budget // max(per_row_bytes, 1))

    tile_n_eff = min(tile_n, max_rows_by_vmem, _round_up(N, row_align))
    tile_n_eff = max(row_align, (tile_n_eff // row_align) * row_align)
    # Keep >= 2 grid steps when there's enough work so ("parallel",) can feed
    # both TensorCores on v7x.
    if N >= 2 * row_align and pl.cdiv(N, tile_n_eff) < 2:
        tile_n_eff = max(row_align, _round_up(pl.cdiv(N, 2), row_align))

    grid = (pl.cdiv(N, tile_n_eff),)             # ragged last block: Pallas clips

    # VMEM limit re-derived from the actual working set; cap at 48 MiB so it
    # still leaves headroom on v7x (64 MiB physical VMEM per TC).
    needed = resident_bytes + tile_n_eff * per_row_bytes + (4 << 20)
    vmem_limit = int(min(max(needed, 32 * 1024 * 1024), 48 * 1024 * 1024))

    cost = pl.CostEstimate(
        flops=2 * N * K * m_pad + 2 * N * m_pad,
        transcendentals=N * m_pad,
        bytes_accessed=(N * K * x_item
                        + K * m_pad * w_item
                        + 2 * m_pad * 4
                        + N * m_pad * o_item),
    )

    out = pl.pallas_call(
        sine_layer_kernel,
        out_shape=jax.ShapeDtypeStruct((N, m_pad), out_dtype),
        grid_spec=pltpu.PrefetchScalarGridSpec(
            num_scalar_prefetch=0,
            grid=grid,
            in_specs=[
                pl.BlockSpec((tile_n_eff, K), lambda i: (i, 0)),   # x row tile
                pl.BlockSpec((K, m_pad), lambda i: (0, 0)),        # resident W'
                pl.BlockSpec((1, m_pad), lambda i: (0, 0)),        # bias row
                pl.BlockSpec((1, m_pad), lambda i: (0, 0)),        # scale row
            ],
            out_specs=pl.BlockSpec((tile_n_eff, m_pad), lambda i: (i, 0)),
        ),
        compiler_params=pltpu.CompilerParams(
            dimension_semantics=("parallel",),   # shards rows across TCs (v7x)
            vmem_limit_bytes=vmem_limit,
        ),
        cost_estimate=cost,
    )(x, wp, bp, sp)

    # Only slice when M is genuinely ragged (padded columns are exact zeros:
    # sin(0)*0 = 0).  With M % 128 == 0 this is a no-op alias.
    if m_pad != M:
        out = out[:, :M]
    return out


def reference_forward(x, w_t, b, scale_vec, omega_0=30.0):
    return scale_vec[None, :] * jnp.sin(omega_0 * (x @ w_t + b[None, :]))


if __name__ == "__main__":
    # Small shapes consistent with the module: a batch of feature vectors.
    # N deliberately not a multiple of the tile to exercise the ragged grid;
    # out_features a multiple of 128 so there is no column pad/slice.
    N = 200
    in_features = 32
    out_features = 128
    omega_0 = 30.0

    key = jax.random.PRNGKey(0)
    kx, kw, kb, ks = jax.random.split(key, 4)

    # Deterministic parameter init mirroring SineLayer.init_weights
    # (is_first=False branch): W ~ U(-sqrt(6/in)/omega0, sqrt(6/in)/omega0)
    w_bound = jnp.sqrt(6.0 / in_features) / omega_0
    W = jax.random.uniform(kw, (out_features, in_features),
                           minval=-w_bound, maxval=w_bound, dtype=jnp.float32)
    # nn.Linear default bias init: U(-1/sqrt(in), 1/sqrt(in))
    b_bound = 1.0 / jnp.sqrt(jnp.float32(in_features))
    b = jax.random.uniform(kb, (out_features,),
                           minval=-b_bound, maxval=b_bound, dtype=jnp.float32)
    # scaleLayer.weight ~ U(0.99, 1.0); scale_vec = scaleLayer.weight[:, 0]
    scale_vec = jax.random.uniform(ks, (out_features,),
                                   minval=0.99, maxval=1.0, dtype=jnp.float32)

    x = jax.random.uniform(kx, (N, in_features),
                           minval=-1.0, maxval=1.0, dtype=jnp.float32)

    w_t = W.T  # (in_features, out_features) for the kernel matmul

    out = sine_layer_forward(x, w_t, b, scale_vec, omega_0=omega_0)
    out = jax.block_until_ready(out)

    ref = reference_forward(x, w_t, b, scale_vec, omega_0=omega_0)
    assert out.shape == (N, out_features)
    assert jnp.allclose(out, ref, atol=1e-4, rtol=1e-4), "mismatch vs reference"

    print("KERNEL_OK")
</pallas_src>

<mosaic_0001>
module attributes {stable_mosaic.version = 11 : i64} {
  func.func @sine_layer_kernel(%arg0: i32, %arg1: memref<104x32xf32, #tpu.memory_space<vmem>>, %arg2: memref<32x128xf32, #tpu.memory_space<vmem>>, %arg3: memref<1x128xf32, #tpu.memory_space<vmem>>, %arg4: memref<1x128xf32, #tpu.memory_space<vmem>>, %arg5: memref<104x128xf32, #tpu.memory_space<vmem>>) attributes {dimension_semantics = [#tpu.dimension_semantics<parallel>], iteration_bounds = array<i64: 2>, scalar_prefetch = 0 : i64, scratch_operands = 0 : i64, tpu.core_type = #tpu.core_type<tc>, window_params = [{transform_indices = @transform_0, window_bounds = array<i64: 104, 32>}, {pipeline_mode = #tpu.pipeline_mode<synchronous>, transform_indices = @transform_1, window_bounds = array<i64: 32, 128>}, {pipeline_mode = #tpu.pipeline_mode<synchronous>, transform_indices = @transform_2, window_bounds = array<i64: 1, 128>}, {pipeline_mode = #tpu.pipeline_mode<synchronous>, transform_indices = @transform_3, window_bounds = array<i64: 1, 128>}, {transform_indices = @transform_4, window_bounds = array<i64: 104, 128>}]} {
    %c0 = arith.constant 0 : index
    %c0_0 = arith.constant 0 : index
    %0 = vector.load %arg1[%c0, %c0_0] : memref<104x32xf32, #tpu.memory_space<vmem>>, vector<104x32xf32>
    %c0_1 = arith.constant 0 : index
    %c0_2 = arith.constant 0 : index
    %1 = vector.load %arg2[%c0_1, %c0_2] : memref<32x128xf32, #tpu.memory_space<vmem>>, vector<32x128xf32>
    %cst = arith.constant dense<0.000000e+00> : vector<104x128xf32>
    %2 = tpu.matmul %0, %1, %cst {dimension_numbers = #tpu.dot_dimension_numbers<[1], [0], [0], [1], [0, 0, 1, 1], [], []>} : vector<104x32xf32>, vector<32x128xf32>, vector<104x128xf32> -> vector<104x128xf32>
    %c0_3 = arith.constant 0 : index
    %c0_4 = arith.constant 0 : index
    %3 = vector.load %arg3[%c0_3, %c0_4] : memref<1x128xf32, #tpu.memory_space<vmem>>, vector<1x128xf32>
    %4 = vector.broadcast %3 : vector<1x128xf32> to vector<104x128xf32>
    %5 = arith.addf %2, %4 : vector<104x128xf32>
    %c0_5 = arith.constant 0 : index
    %c0_6 = arith.constant 0 : index
    %6 = vector.load %arg4[%c0_5, %c0_6] : memref<1x128xf32, #tpu.memory_space<vmem>>, vector<1x128xf32>
    %7 = math.sin %5 : vector<104x128xf32>
    %8 = vector.broadcast %6 : vector<1x128xf32> to vector<104x128xf32>
    %9 = arith.mulf %8, %7 : vector<104x128xf32>
    %c0_7 = arith.constant 0 : index
    %c0_8 = arith.constant 0 : index
    %10 = vector.load %arg5[%c0_7, %c0_8] : memref<104x128xf32, #tpu.memory_space<vmem>>, vector<104x128xf32>
    tpu.vector_store %arg5[%c0_7, %c0_8], %9 {strides = array<i32>} : memref<104x128xf32, #tpu.memory_space<vmem>>, vector<104x128xf32>,
    return
  }
  func.func @transform_0(%arg0: i32) -> (i32, i32) {
    %c0_i32 = arith.constant 0 : i32
    %c0_i32_0 = arith.constant 0 : i32
    return %arg0, %c0_i32 : i32, i32
  }
  func.func @transform_1(%arg0: i32) -> (i32, i32) {
    %c0_i32 = arith.constant 0 : i32
    %c0_i32_0 = arith.constant 0 : i32
    %c0_i32_1 = arith.constant 0 : i32
    return %c0_i32, %c0_i32_0 : i32, i32
  }
  func.func @transform_2(%arg0: i32) -> (i32, i32) {
    %c0_i32 = arith.constant 0 : i32
    %c0_i32_0 = arith.constant 0 : i32
    %c0_i32_1 = arith.constant 0 : i32
    return %c0_i32, %c0_i32_0 : i32, i32
  }
  func.func @transform_3(%arg0: i32) -> (i32, i32) {
    %c0_i32 = arith.constant 0 : i32
    %c0_i32_0 = arith.constant 0 : i32
    %c0_i32_1 = arith.constant 0 : i32
    return %c0_i32, %c0_i32_0 : i32, i32
  }
  func.func @transform_4(%arg0: i32) -> (i32, i32) {
    %c0_i32 = arith.constant 0 : i32
    %c0_i32_0 = arith.constant 0 : i32
    return %arg0, %c0_i32 : i32, i32
  }
}

</mosaic_0001>

<bundles_post_ra>
// kernel: tpu_custom_call.1
= control target key start
LH: loop header
LB: loop body
LE: loop exit
PB: predicated region body
PF: predicated region fallthrough
CT: control target
= control target key end

     0   :  { %9 = vsyncpa [#allocation3], 0  ;;  %s4297_s0 = inlined_call_operand.vmem [shape: f32[200,32], index: 0, kind: input, shape index: {}]   ;;  %s4298_s1 = inlined_call_operand.vmem [shape: f32[32,128], index: 1, kind: input, shape index: {}]   ;;  %s4299_s2 = inlined_call_operand.vmem [shape: f32[1,128], index: 2, kind: input, shape index: {}]   ;;  %s4300_s3 = inlined_call_operand.vmem [shape: f32[1,128], index: 3, kind: input, shape index: {}]   ;;  %s4301_s4 = inlined_call_operand.hbm [shape: f32[200,128], index: 4, kind: output, shape index: {}]  }
   0x1   :  { %11 = vsyncpa [#allocation3 + $0x1], 0  ;;  %s2711_s15 = smov 0   ;;  %s2713_s16 = smov 0  }
   0x2   :  { %s2715_s17 = smov 0   ;;  %s2717_s18 = smov 0  }
   0x3 LB: > { %s2732_s19 = sadd.s32 4294967295, %s2674_s18   ;;  %s2470_s20 = sadd.s32 4294967294, %s2674_s18   ;;  %s2674_s18 = sphi %s2717_s18, %s4324_s18   ;;  %s2670_s17 = sphi %s2715_s17, %s4323_s17   ;;  %s2666_s16 = sphi %s2713_s16, %s4322_s16   ;;  %s2662_s15 = sphi %s2711_s15, %s4321_s15  }
   0x4   : > { %s2736_s21 = sadd.s32 1, %s2674_s18   ;;  %s113_s22 = sadd.s32 1, %s2670_s17 }
   0x5   : > { %s110_s23 = ssub.s32 %s2674_s18, %s2736_s21  ;;  %p123_p0 = scmp.ne.s32.totalorder %s2670_s17, %s2666_s16 }
   0x6   : > { %p111_p1 = scmp.eq.s32.totalorder %s110_s23, 0  ;;  %p124_p2 = scmp.eq.s32.totalorder %s2732_s19, 1 }
   0x7   : > { %p129_p3 = scmp.ne.s32.totalorder %s2666_s16, %s2662_s15  ;;  %p130_p4 = scmp.eq.s32.totalorder %s2470_s20, 1 }
   0x8   : > { %s2747_s24 = scalar_select %p111_p1, %s2670_s17, %s113_s22  }
   0x9   : > { %p2749_p5 = por %p124_p2, %p123_p0  ;;  %p2753_p6 = por %p130_p4, %p129_p3 }
   0xa   : > { %p2473_p7 = scmp.ge.s32.totalorder %s2674_s18, 1  ;;  %p174_p8 = scmp.lt.s32.totalorder %s2674_s18, 3 }
   0xc   : > { %p175_p9 = pnand %p2473_p7, %p174_p8 }
   0xd   : > { %s2766_s5 = smul.u32 (!%p175_p9), 13, %s2732_s19  ;;  %s201_s20 = sand.u32 (!%p175_p9), 1, %s2666_s16  }
   0xe   : > { %178 = sbr.rel (%p175_p9) target bundleno = 719 (0x2cf), region = 36 }
   0xf   : > { %p209_p10 = scmp.lt.s32.totalorder (!%p175_p9), %s2766_s5, 24  ;;  %s2547_s27 = smul.u32 (!%p175_p9), 104, %s201_s20 }
  0x11   : > { %s3119_s30 = scalar_lea.vmem (!%p175_p9), [#allocation2], %s2547_s27 }
  0x13   : > { %v239_v0 = vld [vmem:[%s4298_s1 + $0x18] sm:$0xff]  ;;  %v238_v1 = vld [vmem:[%s4298_s1 + $0x10] sm:$0xff]  ;;  %v237_v2 = vld [vmem:[%s4298_s1 + $0x8] sm:$0xff]  ;;  %s210_s10 = scalar_select %p209_p10, %s2766_s5, 24  ;;  %vm244_vm0 = vcmask 261120  }
  0x14   : > { %296 = vmatpush.msra.mxu0 %v239_v0  ;;  %2535 = vmatpush.msra.mxu1 %v239_v0  ;;  %v236_v3 = vld [vmem:[%s4298_s1] sm:$0xff]  ;;  %v2676_v46 = vmov 683565275   ;;  %v2677_v48 = vmov 2475754826   ;;  %s2394_s22 = ssub.s32 (%p2749_p5), 25, %s2766_s5 }
  0x15   : > { %2536 = vmatpush.msra.mxu2 %v239_v0  ;;  %2537 = vmatpush.msra.mxu3 %v239_v0  ;;  %s2474_s11 = sshll.u32 %s210_s10, 3  ;;  %v2796_v17 = vld [vmem:[%s4299_s2] ss:$0 sm:$0xff]  ;;  %v2678_v50 = vmov 2131351028   ;;  %p2395_p11 = scmp.lt.s32.totalorder (%p2749_p5), %s2394_s22, 13 }
  0x16   : > { %297 = vmatpush.msra.mxu0 %v238_v1  ;;  %2538 = vmatpush.msra.mxu1 %v238_v1  ;;  %s212_s14 = scalar_lea.vmem %s4297_s0, %s2474_s11  ;;  %v2679_v52 = vmov 2102212464   ;;  %v2680_v54 = vmov 920167782   ;;  %v2681_v63 = vmov 1326507024  }
  0x17   : > { %2539 = vmatpush.msra.mxu2 %v238_v1  ;;  %2540 = vmatpush.msra.mxu3 %v238_v1  ;;  %v223_v4 = vld [vmem:[%s212_s14] sm:$0xff]  ;;  %v226_v5 = vld [vmem:[%s212_s14 + $0x18] sm:$0xff]  ;;  %v229_v6 = vld [vmem:[%s212_s14 + $0x30] sm:$0xff] }
  0x18   : > { %298 = vmatpush.msra.mxu0 %v237_v2  ;;  %2541 = vmatpush.msra.mxu1 %v237_v2  ;;  %v233_v7 = vld [vmem:[%s212_s14 + $0x50] sm:$0xff]  ;;  %v224_v8 = vld [vmem:[%s212_s14 + $0x8] sm:$0xff]  ;;  %v227_v9 = vld [vmem:[%s212_s14 + $0x20] sm:$0xff] }
  0x19   : > { %2542 = vmatpush.msra.mxu2 %v237_v2  ;;  %2543 = vmatpush.msra.mxu3 %v237_v2  ;;  %v230_v10 = vld [vmem:[%s212_s14 + $0x38] sm:$0xff]  ;;  %v225_v12 = vld [vmem:[%s212_s14 + $0x10] sm:$0xff]  ;;  %v228_v13 = vld [vmem:[%s212_s14 + $0x28] sm:$0xff] }
  0x1a   : > { %299 = vmatpush.msra.mxu0 %v236_v3  ;;  %2544 = vmatpush.msra.mxu1 %v236_v3  ;;  %v234_v11 = vld [vmem:[%s212_s14 + $0x58] sm:$0xff]  ;;  %v231_v14 = vld [vmem:[%s212_s14 + $0x40] sm:$0xff]  ;;  %v232_v16 = vld [vmem:[%s212_s14 + $0x48] sm:$0xff] }
  0x1b   : > { %2545 = vmatpush.msra.mxu2 %v236_v3  ;;  %2546 = vmatpush.msra.mxu3 %v236_v3  ;;  %v235_v15 = vld [vmem:[%s212_s14 + $0x60] sm:$0xff]  ;;  %s4236_s14 = scalar_lea.sflag [#allocation3], %s201_s20 }
  0x1c   : > { %2475 = vmatmul.msk.f32.vlgmr.msra.gmra.mxu0 %vm244_vm0, %v223_v4  ;;  %2478 = vmatmul.msk.f32.vlgmr.msra.gmra.mxu1 %vm244_vm0, %v226_v5 }
  0x1d   : > { %2481 = vmatmul.msk.f32.vlgmr.msra.gmra.mxu2 %vm244_vm0, %v229_v6  ;;  %2485 = vmatmul.msk.f32.vlgmr.msra.gmra.mxu3 %vm244_vm0, %v233_v7 }
  0x24   : > { %2476 = vmatmul.msk.f32.gmra.mxu0 %vm244_vm0, %v224_v8  ;;  %2479 = vmatmul.msk.f32.gmra.mxu1 %vm244_vm0, %v227_v9 }
  0x25   : > { %2482 = vmatmul.msk.f32.gmra.mxu2 %vm244_vm0, %v230_v10  ;;  %2486 = vmatmul.msk.f32.gmra.mxu3 %vm244_vm0, %v234_v11 }
  0x2c   : > { %2477 = vmatmul.msk.f32.gmra.mxu0 %vm244_vm0, %v225_v12  ;;  %2480 = vmatmul.msk.f32.gmra.mxu1 %vm244_vm0, %v228_v13 }
  0x2d   : > { %2483 = vmatmul.msk.f32.gmra.mxu2 %vm244_vm0, %v231_v14  ;;  %2487 = vmatmul.msk.f32.gmra.mxu3 %vm244_vm0, %v235_v15 }
  0x35   : > { %2484 = vmatmul.msk.f32.gmra.mxu2 %vm244_vm0, %v232_v16 }
  0x99   : > { %v301_v18 = vpop.f32.mrf.mxu0  ;;  %v310_v19 = vpop.f32.mrf.mxu1 }
  0x9a   : > { %v2799_v20 = vadd.f32 %v2796_v17, %v301_v18  ;;  %v2802_v21 = vadd.f32 %v2796_v17, %v310_v19 }
  0x9c   : > { %v341_v22 = vand.u32 2147483647, %v2799_v20  ;;  %v344_v23 = vand.u32 2139095040, %v2799_v20  ;;  %v806_v24 = vand.u32 2147483647, %v2802_v21  ;;  %v809_v25 = vand.u32 2139095040, %v2802_v21 }
  0x9e   : > { %v345_v26 = vshrl.u32 %v344_v23, 23  ;;  %v348_v27 = vand.u32 8388607, %v341_v22  ;;  %v810_v28 = vshrl.u32 %v809_v25, 23  ;;  %v813_v29 = vand.u32 8388607, %v806_v24 }
  0xa0   : > { %v2488_v30 = vadd.s32 4294967169, %v345_v26  ;;  %v349_v31 = vor.u32 8388608, %v348_v27  ;;  %v2497_v32 = vadd.s32 4294967169, %v810_v28  ;;  %v814_v34 = vor.u32 8388608, %v813_v29  ;;  %v319_v36 = vpop.f32.mrf.mxu2 }
  0xa1   : > { %v2815_v41 = vadd.f32 %v2796_v17, %v319_v36 }
  0xa2   : > { %v351_v33 = vadd.s32 1, %v2488_v30  ;;  %v816_v35 = vadd.s32 1, %v2497_v32  ;;  %v2812_v38 = vshll.u32 %v349_v31, 8  ;;  %v2821_v44 = vshll.u32 %v814_v34, 8 }
  0xa3   : > { %v1274_v61 = vand.u32 2139095040, %v2815_v41 }
  0xa4   : > { %vm352_vm1 = vcmp.gt.s32.totalorder %v351_v33, 0  ;;  %vm817_vm2 = vcmp.gt.s32.totalorder %v816_v35, 0  ;;  %v390_v56 = vand.u32 65535, %v2812_v38  ;;  %v391_v57 = vshrl.u32 %v2812_v38, 16 }
  0xa5   : > { %v353_v37 = vsel %vm352_vm1, %v351_v33, 0  ;;  %v818_v40 = vsel %vm817_vm2, %v816_v35, 0  ;;  %v2843_v7 = vand.u32 65535, %v2821_v44  ;;  %v2874_v27 = vshrl.u32 %v2821_v44, 16 }
  0xa6   : > { %v355_v39 = vand.u32 31, %v353_v37  ;;  %v2817_v42 = vshrl.u32 %v353_v37, 5  ;;  %v2819_v43 = vand.u32 31, %v818_v40  ;;  %v2880_v34 = vshrl.u32 %v818_v40, 5 }
  0xa8   : > { %v356_v45 = vsub.s32 32, %v355_v39  ;;  %v358_v47 = vshll.u32 %v2676_v46, %v355_v39  ;;  %v361_v49 = vshll.u32 %v2677_v48, %v355_v39  ;;  %v364_v51 = vshll.u32 %v2678_v50, %v355_v39 }
  0xa9   : > { %v367_v53 = vshll.u32 %v2679_v52, %v355_v39  ;;  %v370_v55 = vshll.u32 %v2680_v54, %v355_v39  ;;  %vm373_vm3 = vcmp.lt.s32.totalorder %v2817_v42, 1  ;;  %vm376_vm4 = vcmp.lt.s32.totalorder %v2817_v42, 4 }
  0xaa   : > { %v359_v58 = vshrl.u32 %v2677_v48, %v356_v45  ;;  %v362_v59 = vshrl.u32 %v2678_v50, %v356_v45  ;;  %v365_v60 = vshrl.u32 %v2679_v52, %v356_v45  ;;  %v368_v62 = vshrl.u32 %v2680_v54, %v356_v45 }
  0xab   : > { %v371_v0 = vshrl.u32 %v2681_v63, %v356_v45  ;;  %v2839_v4 = vsub.s32 32, %v2819_v43  ;;  %vm375_vm5 = vcmp.lt.s32.totalorder %v2817_v42, 3  ;;  %v357_v8 = vshrl.u32 %v2676_v46, %v356_v45 }
  0xac   : > { %v360_v1 = vor.u32 %v359_v58, %v358_v47  ;;  %v363_v2 = vor.u32 %v362_v59, %v361_v49  ;;  %v366_v3 = vor.u32 %v365_v60, %v364_v51  ;;  %v369_v5 = vor.u32 %v368_v62, %v367_v53 }
  0xad   : > { %v372_v6 = vor.u32 %v371_v0, %v370_v55  ;;  %vm374_vm6 = vcmp.lt.s32.totalorder %v2817_v42, 2  ;;  %v823_v13 = vshll.u32 %v2676_v46, %v2819_v43  ;;  %v826_v14 = vshll.u32 %v2677_v48, %v2819_v43 }
  0xae   : > { %v381_v9 = vsel %vm373_vm3, %v360_v1, %v363_v2  ;;  %v385_v10 = vsel %vm373_vm3, %v363_v2, %v366_v3  ;;  %v382_v11 = vsel %vm376_vm4, %v369_v5, 920167782  ;;  %v378_v15 = vsel %vm376_vm4, %v366_v3, 2102212464 }
  0xaf   : > { %v386_v12 = vsel %vm376_vm4, %v372_v6, 1326507024  ;;  %v383_v16 = vsel %vm375_vm5, %v366_v3, %v382_v11  ;;  %v824_v19 = vshrl.u32 %v2677_v48, %v2839_v4  ;;  %v827_v26 = vshrl.u32 %v2678_v50, %v2839_v4 }
  0xb0   : > { %v387_v18 = vsel %vm375_vm5, %v369_v5, %v386_v12  ;;  %v384_v23 = vsel %vm374_vm6, %v381_v9, %v383_v16  ;;  %v377_v32 = vsel %vm373_vm3, %v357_v8, %v360_v1  ;;  %v379_v33 = vsel %vm375_vm5, %v363_v2, %v378_v15 }
  0xb1   : > { %v388_v25 = vsel %vm374_vm6, %v385_v10, %v387_v18  ;;  %v414_v30 = vand.u32 65535, %v384_v23  ;;  %v415_v31 = vshrl.u32 %v384_v23, 16  ;;  %v2882_v35 = vor.u32 %v824_v19, %v823_v13 }
  0xb2   : > { %v392_v28 = vand.u32 65535, %v388_v25  ;;  %v393_v29 = vshrl.u32 %v388_v25, 16  ;;  %v2884_v45 = vor.u32 %v827_v26, %v826_v14  ;;  %v829_v53 = vshll.u32 %v2678_v50, %v2819_v43 }
  0xb3   : > { %v416_v47 = vmul.u32 %v414_v30, %v390_v56  ;;  %v417_v49 = vmul.u32 %v415_v31, %v390_v56  ;;  %v418_v51 = vmul.u32 %v414_v30, %v391_v57  ;;  %v830_v40 = vshrl.u32 %v2679_v52, %v2839_v4 }
  0xb4   : > { %v394_v36 = vmul.u32 %v392_v28, %v390_v56  ;;  %v395_v37 = vmul.u32 %v393_v29, %v390_v56  ;;  %v396_v39 = vmul.u32 %v392_v28, %v391_v57  ;;  %v397_v55 = vmul.u32 %v393_v29, %v391_v57 }
  0xb5   : > { %v419_v62 = vmul.u32 %v415_v31, %v391_v57  ;;  %v420_v0 = vshll.u32 %v417_v49, 16  ;;  %v422_v1 = vshll.u32 %v418_v51, 16  ;;  %v832_v56 = vshll.u32 %v2679_v52, %v2819_v43 }
  0xb6   : > { %v398_v58 = vshll.u32 %v395_v37, 16  ;;  %v400_v59 = vshll.u32 %v396_v39, 16  ;;  %v399_v60 = vshrl.u32 %v395_v37, 16  ;;  %v401_v2 = vshrl.u32 %v396_v39, 16 }
  0xb7   : > { %v2682_v5 = vmov 0   ;;  %vm424_vm8 = vc.u32 %v416_v47, %v420_v0  ;;  %v426_v8 = vadd.s32 %v420_v0, %v416_v47  ;;  %v833_v9 = vshrl.u32 %v2680_v54, %v2839_v4 }
  0xb8   : > { %vm402_vm7 = vc.u32 %v394_v36, %v398_v58  ;;  %v404_v3 = vadd.s32 %v398_v58, %v394_v36  ;;  %v425_v57 = vsel %vm424_vm8, 1, %v2682_v5  ;;  %v835_v11 = vshll.u32 %v2680_v54, %v2819_v43 }
  0xb9   : > { %v403_v6 = vsel %vm402_vm7, 1, %v2682_v5  ;;  %v427_v13 = vadd.s32 %v425_v57, %v419_v62  ;;  %vm428_vm10 = vc.u32 %v426_v8, %v422_v1  ;;  %v831_v14 = vor.u32 %v830_v40, %v829_v53 }
  0xba   : > { %v405_v10 = vadd.s32 %v403_v6, %v397_v55  ;;  %vm406_vm9 = vc.u32 %v404_v3, %v400_v59  ;;  %v429_v16 = vsel %vm428_vm10, 1, %v2682_v5  ;;  %v834_v18 = vor.u32 %v833_v9, %v832_v56 }
  0xbb   : > { %v407_v12 = vsel %vm406_vm9, 1, %v2682_v5  ;;  %v836_v19 = vshrl.u32 %v2681_v63, %v2839_v4  ;;  %v421_v23 = vshrl.u32 %v417_v49, 16  ;;  %v431_v25 = vadd.s32 %v429_v16, %v427_v13 }
  0xbc   : > { %v409_v15 = vadd.s32 %v407_v12, %v405_v10  ;;  %vm838_vm11 = vcmp.lt.s32.totalorder %v2880_v34, 1  ;;  %vm840_vm12 = vcmp.lt.s32.totalorder %v2880_v34, 3  ;;  %vm839_vm13 = vcmp.lt.s32.totalorder %v2880_v34, 2 }
  0xbd   : > { %v837_v43 = vor.u32 %v836_v19, %v835_v11  ;;  %vm841_vm14 = vcmp.lt.s32.totalorder %v2880_v34, 4  ;;  %v423_v28 = vshrl.u32 %v418_v51, 16  ;;  %v432_v29 = vadd.s32 %v431_v25, %v421_v23 }
  0xbe   : > { %v410_v26 = vadd.s32 %v409_v15, %v399_v60  ;;  %v846_v30 = vsel %vm838_vm11, %v2882_v35, %v2884_v45  ;;  %v847_v31 = vsel %vm841_vm14, %v834_v18, 920167782  ;;  %v2914_v37 = vadd.s32 %v426_v8, %v422_v1 }
  0xbf   : > { %v848_v39 = vsel %vm840_vm12, %v831_v14, %v847_v31  ;;  %v850_v47 = vsel %vm838_vm11, %v2884_v45, %v831_v14  ;;  %v380_v49 = vsel %vm374_vm6, %v377_v32, %v379_v33  ;;  %v433_v51 = vadd.s32 %v432_v29, %v423_v28 }
  0xc0   : > { %v2912_v36 = vadd.s32 %v410_v26, %v401_v2  ;;  %v849_v53 = vsel %vm839_vm13, %v846_v30, %v848_v39  ;;  %v851_v55 = vsel %vm841_vm14, %v837_v43, 1326507024  ;;  %v434_v32 = vmul.u32 %v2812_v38, %v380_v49 }
  0xc1   : > { %v852_v58 = vsel %vm840_vm12, %v834_v18, %v851_v55  ;;  %v879_v59 = vand.u32 65535, %v849_v53  ;;  %v437_v40 = vadd.s32 1, %v433_v51  ;;  %v880_v42 = vshrl.u32 %v849_v53, 16 }
  0xc2   : > { %vm436_vm15 = vc.u32 %v2912_v36, %v2914_v37  ;;  %v853_v60 = vsel %vm839_vm13, %v850_v47, %v852_v58  ;;  %v1275_v56 = vshrl.u32 %v1274_v61, 23  ;;  %v822_v38 = vshrl.u32 %v2676_v46, %v2839_v4 }
  0xc3   : > { %v857_v33 = vand.u32 65535, %v853_v60  ;;  %v858_v62 = vshrl.u32 %v853_v60, 16  ;;  %v883_v0 = vmul.u32 %v879_v59, %v2874_v27  ;;  %v438_v1 = vsel %vm436_vm15, %v437_v40, %v433_v51 }
  0xc4   : > { %v881_v2 = vmul.u32 %v879_v59, %v2843_v7  ;;  %v882_v3 = vmul.u32 %v880_v42, %v2843_v7  ;;  %v439_v6 = vadd.s32 %v438_v1, %v434_v32  ;;  %v843_v57 = vsel %vm841_vm14, %v831_v14, 2102212464 }
  0xc5   : > { %v859_v8 = vmul.u32 %v857_v33, %v2843_v7  ;;  %v860_v9 = vmul.u32 %v858_v62, %v2843_v7  ;;  %v861_v10 = vmul.u32 %v857_v33, %v2874_v27  ;;  %v887_v12 = vshll.u32 %v883_v0, 16 }
  0xc6   : > { %v885_v11 = vshll.u32 %v882_v3, 16  ;;  %v440_v13 = vadd.s32 536870912, %v439_v6  ;;  %v884_v61 = vmul.u32 %v880_v42, %v2874_v27  ;;  %v862_v18 = vmul.u32 %v858_v62, %v2874_v27 }
  0xc7   : > { %v863_v15 = vshll.u32 %v860_v9, 16  ;;  %v865_v16 = vshll.u32 %v861_v10, 16  ;;  %v2506_v7 = vadd.s32 4294967169, %v1275_v56  ;;  %v1271_v43 = vand.u32 2147483647, %v2815_v41 }
  0xc8   : > { %vm889_vm0 = vc.u32 %v881_v2, %v885_v11  ;;  %v891_v19 = vadd.s32 %v885_v11, %v881_v2  ;;  %v441_v23 = vshrl.u32 %v440_v13, 30  ;;  %v842_v29 = vsel %vm838_vm11, %v822_v38, %v2882_v35 }
  0xc9   : > { %vm867_vm1 = vc.u32 %v859_v8, %v863_v15  ;;  %v869_v25 = vadd.s32 %v863_v15, %v859_v8  ;;  %v890_v4 = vsel %vm889_vm0, 1, %v2682_v5  ;;  %v844_v30 = vsel %vm840_vm12, %v2884_v45, %v843_v57 }
  0xca   : > { %v868_v26 = vsel %vm867_vm1, 1, %v2682_v5  ;;  %v892_v14 = vadd.s32 %v890_v4, %v884_v61  ;;  %vm893_vm2 = vc.u32 %v891_v19, %v887_v12  ;;  %v442_v28 = vshll.u32 %v441_v23, 30 }
  0xcb   : > { %v870_v27 = vadd.s32 %v868_v26, %v862_v18  ;;  %vm871_vm3 = vc.u32 %v869_v25, %v865_v16  ;;  %v894_v39 = vsel %vm893_vm2, 1, %v2682_v5  ;;  %v1281_v47 = vadd.s32 1, %v2506_v7 }
  0xcc   : > { %v872_v31 = vsel %vm871_vm3, 1, %v2682_v5  ;;  %v443_v49 = vsub.s32 %v439_v6, %v442_v28  ;;  %v864_v51 = vshrl.u32 %v860_v9, 16  ;;  %v896_v55 = vadd.s32 %v894_v39, %v892_v14 }
  0xcd   : > { %v874_v53 = vadd.s32 %v872_v31, %v870_v27  ;;  %vm343_vm4 = vcmp.lt.s32.totalorder %v2799_v20, 0  ;;  %v465_v58 = vsub.s32 4, %v441_v23  ;;  %v886_v59 = vshrl.u32 %v882_v3, 16 }
  0xce   : > { %vm1282_vm5 = vcmp.gt.s32.totalorder %v1281_v47, 0  ;;  %vm444_vm6 = vcmp.lt.s32.totalorder %v443_v49, 0  ;;  %v445_v35 = vsub.s32 0, %v443_v49  ;;  %v866_v40 = vshrl.u32 %v861_v10, 16 }
  0xcf   : > { %v875_v60 = vadd.s32 %v874_v53, %v864_v51  ;;  %v845_v45 = vsel %vm839_vm13, %v842_v29, %v844_v30  ;;  %v888_v42 = vshrl.u32 %v883_v0, 16  ;;  %v897_v32 = vadd.s32 %v896_v55, %v886_v59 }
  0xd0   : > { %v1283_v33 = vsel %vm1282_vm5, %v1281_v47, 0  ;;  %v446_v62 = vsel %vm444_vm6, %v445_v35, %v443_v49  ;;  %v2964_v2 = vadd.s32 %v891_v19, %v887_v12  ;;  %v1278_v56 = vand.u32 8388607, %v1271_v43 }
  0xd1   : > { %v2962_v1 = vadd.s32 %v875_v60, %v866_v40  ;;  %v447_v3 = vclz %v446_v62  ;;  %v466_v6 = vsel %vm343_vm4, %v465_v58, %v441_v23  ;;  %v898_v8 = vadd.s32 %v897_v32, %v888_v42 }
  0xd2   : > { %v1285_v9 = vand.u32 31, %v1283_v33  ;;  %vm2972_vm7 = vcmp.le.f32.partialorder %v341_v22, 0.7853982  ;;  %v435_v0 = vadd.s32 %v2914_v37, %v2912_v36  ;;  %v899_v10 = vmul.u32 %v2821_v44, %v845_v45 }
  0xd3   : > { %v2489_v38 = vadd.s32 4294967294, %v447_v3  ;;  %vm901_vm8 = vc.u32 %v2962_v1, %v2964_v2  ;;  %v902_v57 = vadd.s32 1, %v898_v8  ;;  %v468_v12 = vsel %vm2972_vm7, 0, %v466_v6 }
  0xd4   : > { %v1286_v11 = vsub.s32 32, %v1285_v9  ;;  %v1279_v13 = vor.u32 8388608, %v1278_v56  ;;  %v2983_v15 = vshrl.u32 %v1283_v33, 5  ;;  %v1288_v22 = vshll.u32 %v2676_v46, %v1285_v9 }
  0xd5   : > { %vm2490_vm9 = vcmp.lt.s32.totalorder %v2489_v38, 0  ;;  %v903_v16 = vsel %vm901_vm8, %v902_v57, %v898_v8  ;;  %v1291_v44 = vshll.u32 %v2677_v48, %v1285_v9  ;;  %v1294_v19 = vshll.u32 %v2678_v50, %v1285_v9 }
  0xd6   : > { %v1289_v36 = vshrl.u32 %v2677_v48, %v1286_v11  ;;  %v450_v37 = vsel %vm2490_vm9, 0, %v2489_v38  ;;  %v904_v61 = vadd.s32 %v903_v16, %v899_v10  ;;  %v1292_v18 = vshrl.u32 %v2678_v50, %v1286_v11 }
  0xd7   : > { %v451_v7 = vsub.s32 32, %v450_v37  ;;  %v455_v23 = vsub.s32 4294967266, %v450_v37  ;;  %v1295_v25 = vshrl.u32 %v2679_v52, %v1286_v11  ;;  %v1297_v4 = vshll.u32 %v2679_v52, %v1285_v9 }
  0xd8   : > { %v452_v26 = vshll.u32 %v443_v49, %v450_v37  ;;  %v905_v14 = vadd.s32 536870912, %v904_v61  ;;  %v1290_v28 = vor.u32 %v1289_v36, %v1288_v22  ;;  %v1298_v29 = vshrl.u32 %v2680_v54, %v1286_v11 }
  0xd9   : > { %v453_v27 = vshrl.u32 %v435_v0, %v451_v7  ;;  %v456_v30 = vadd.s32 127, %v455_v23  ;;  %v2993_v31 = vor.u32 %v1292_v18, %v1291_v44  ;;  %v1301_v39 = vshrl.u32 %v2681_v63, %v1286_v11 }
  0xda   : > { %v2996_v47 = vshrl.u32 %v905_v14, 30  ;;  %v1299_v51 = vor.u32 %v1298_v29, %v1297_v4  ;;  %v2998_v53 = vshll.u32 %v1279_v13, 8  ;;  %v1296_v59 = vor.u32 %v1295_v25, %v1294_v19  ;;  %v331_v13 = vpop.f32.mrf.mxu3 }
  0xdb   : > { %v454_v55 = vor.u32 %v453_v27, %v452_v26  ;;  %v457_v58 = vshll.u32 %v456_v30, 23  ;;  %v1300_v49 = vshll.u32 %v2680_v54, %v1285_v9  ;;  %v485_v35 = vadd.s32 3, %v468_v12 }
  0xdc   : > { %v907_v40 = vshll.u32 %v2996_v47, 30  ;;  %vm1303_vm10 = vcmp.lt.s32.totalorder %v2983_v15, 1  ;;  %vm1306_vm11 = vcmp.lt.s32.totalorder %v2983_v15, 4  ;;  %vm1305_vm12 = vcmp.lt.s32.totalorder %v2983_v15, 3 }
  0xdd   : > { %v458_v60 = vor.u32 4788187, %v457_v58  ;;  %v1302_v45 = vor.u32 %v1301_v39, %v1300_v49  ;;  %v1311_v42 = vsel %vm1303_vm10, %v1290_v28, %v2993_v31  ;;  %v1312_v33 = vsel %vm1306_vm11, %v1299_v51, 920167782 }
  0xde   : > { %v3007_v32 = vsub.s32 %v904_v61, %v907_v40  ;;  %v1320_v62 = vand.u32 65535, %v2998_v53  ;;  %v461_v3 = vcvt.s32.f32 %v454_v55  ;;  %vm1304_vm13 = vcmp.lt.s32.totalorder %v2983_v15, 2 }
  0xdf   : > { %v459_v56 = vand.u32 2147483647, %v458_v60  ;;  %v1313_v6 = vsel %vm1305_vm12, %v1296_v59, %v1312_v33  ;;  %v1321_v0 = vshrl.u32 %v2998_v53, 16  ;;  %v3021_v38 = vand.u32 3, %v485_v35 }
  0xe0   : > { %vm909_vm14 = vcmp.lt.s32.totalorder %v3007_v32, 0  ;;  %v910_v8 = vsub.s32 0, %v3007_v32  ;;  %v1314_v9 = vsel %vm1304_vm13, %v1311_v42, %v1313_v6  ;;  %v1315_v57 = vsel %vm1303_vm10, %v2993_v31, %v1296_v59 }
  0xe1   : > { %v462_v10 = vmul.f32 %v461_v3, %v459_v56  ;;  %v1316_v12 = vsel %vm1306_vm11, %v1302_v45, 1326507024  ;;  %v1287_v16 = vshrl.u32 %v2676_v46, %v1286_v11  ;;  %v1344_v44 = vand.u32 65535, %v1314_v9 }
  0xe2   : > { %v911_v22 = vsel %vm909_vm14, %v910_v8, %v3007_v32  ;;  %v1317_v36 = vsel %vm1305_vm12, %v1299_v51, %v1316_v12  ;;  %v1345_v19 = vshrl.u32 %v1314_v9, 16  ;;  %v900_v7 = vadd.s32 %v2964_v2, %v2962_v1 }
  0xe3   : > { %v463_v37 = vxor.u32 2147483648, %v462_v10  ;;  %v912_v61 = vclz %v911_v22  ;;  %v1318_v18 = vsel %vm1304_vm13, %v1315_v57, %v1317_v36  ;;  %v930_v23 = vsub.s32 4, %v2996_v47 }
  0xe4   : > { %v1322_v25 = vand.u32 65535, %v1318_v18  ;;  %v3038_v4 = vadd.f32 %v2796_v17, %v331_v13  ;;  %v3044_v14 = vsel %vm1303_vm10, %v1287_v16, %v1290_v28  ;;  %v1323_v29 = vshrl.u32 %v1318_v18, 16 }
  0xe5   : > { %v464_v11 = vsel %vm343_vm4, %v463_v37, %v462_v10  ;;  %v2498_v26 = vadd.s32 4294967294, %v912_v61  ;;  %v3053_v1 = vsel %vm1306_vm11, %v1296_v59, 2102212464  ;;  %v1346_v30 = vmul.u32 %v1344_v44, %v1320_v62 }
  0xe6   : > { %v3049_v27 = vsel %vm2972_vm7, %v2799_v20, %v464_v11  ;;  %v1326_v2 = vmul.u32 %v1322_v25, %v1321_v0  ;;  %v1325_v51 = vmul.u32 %v1323_v29, %v1320_v62  ;;  %v3057_v55 = vmul.u32 %v1345_v19, %v1320_v62 }
  0xe7   : > { %v469_v39 = vmul.f32 %v3049_v27, %v3049_v27  ;;  %vm2499_vm15 = vcmp.lt.s32.totalorder %v2498_v26, 0  ;;  %v1324_v58 = vmul.u32 %v1322_v25, %v1320_v62  ;;  %v1327_v49 = vmul.u32 %v1323_v29, %v1321_v0 }
  0xe8   : > { %v915_v28 = vsel %vm2499_vm15, 0, %v2498_v26  ;;  %v3059_v35 = vmul.u32 %v1344_v44, %v1321_v0  ;;  %v1330_v45 = vshll.u32 %v1326_v2, 16  ;;  %vm808_vm0 = vcmp.lt.s32.totalorder %v2802_v21, 0 }
  0xe9   : > { %v470_v34 = vmul.f32 -0.001358992, %v469_v39  ;;  %v477_v40 = vmul.f32 -0.00019511016, %v469_v39  ;;  %v916_v60 = vsub.s32 32, %v915_v28  ;;  %v920_v59 = vsub.s32 4294967266, %v915_v28 }
  0xea   : > { %v1328_v42 = vshll.u32 %v1325_v51, 16  ;;  %v1331_v33 = vshrl.u32 %v1326_v2, 16  ;;  %v1349_v56 = vmul.u32 %v1345_v19, %v1321_v0  ;;  %v917_v8 = vshll.u32 %v3007_v32, %v915_v28 }
  0xeb   : > { %v471_v3 = vadd.f32 0.041655596, %v470_v34  ;;  %v478_v6 = vadd.f32 0.008332121, %v477_v40  ;;  %v918_v9 = vshrl.u32 %v900_v7, %v916_v60  ;;  %v921_v10 = vadd.s32 127, %v920_v59 }
  0xec   : > { %vm1332_vm1 = vc.u32 %v1324_v58, %v1328_v42  ;;  %v1334_v62 = vadd.s32 %v1328_v42, %v1324_v58  ;;  %v1350_v57 = vshll.u32 %v3057_v55, 16  ;;  %vm3067_vm2 = vcmp.le.f32.partialorder %v806_v24, 0.7853982 }
  0xed   : > { %v472_v12 = vmul.f32 %v471_v3, %v469_v39  ;;  %v479_v13 = vmul.f32 %v478_v6, %v469_v39  ;;  %v919_v22 = vor.u32 %v918_v9, %v917_v8  ;;  %v1333_v16 = vsel %vm1332_vm1, 1, %v2682_v5 }
  0xee   : > { %v922_v0 = vshll.u32 %v921_v10, 23  ;;  %v1329_v44 = vshrl.u32 %v1325_v51, 16  ;;  %v1335_v32 = vadd.s32 %v1333_v16, %v1327_v49  ;;  %vm1336_vm3 = vc.u32 %v1334_v62, %v1330_v45 }
  0xef   : > { %v473_v37 = vadd.f32 -0.4999988, %v472_v12  ;;  %v480_v61 = vadd.f32 -0.16666654, %v479_v13  ;;  %v1337_v18 = vsel %vm1336_vm3, 1, %v2682_v5  ;;  %v1352_v19 = vshll.u32 %v3059_v35, 16 }
  0xf0   : > { %vm488_vm4 = vcmp.eq.s32.totalorder %v3021_v38, 0  ;;  %v923_v7 = vor.u32 4788187, %v922_v0  ;;  %v1339_v25 = vadd.s32 %v1337_v18, %v1335_v32  ;;  %vm1354_vm5 = vc.u32 %v1346_v30, %v1350_v57 }
  0xf1   : > { %v1356_v11 = vadd.s32 %v1350_v57, %v1346_v30  ;;  %v474_v24 = vmul.f32 %v473_v37, %v469_v39  ;;  %v481_v26 = vmul.f32 %v480_v61, %v469_v39  ;;  %vm487_vm6 = vcmp.lt.s32.totalorder %v3021_v38, 2 }
  0xf2   : > { %v926_v29 = vcvt.s32.f32 %v919_v22  ;;  %v1355_v2 = vsel %vm1354_vm5, 1, %v2682_v5  ;;  %vm484_vm7 = vweird.f32 %v2799_v20  ;;  %v924_v51 = vand.u32 2147483647, %v923_v7 }
  0xf3   : > { %v1340_v28 = vadd.s32 %v1339_v25, %v1329_v44  ;;  %v1357_v58 = vadd.s32 %v1355_v2, %v1349_v56  ;;  %vm1358_vm8 = vc.u32 %v1356_v11, %v1352_v19  ;;  %v475_v49 = vadd.f32 1.0, %v474_v24 }
  0xf4   : > { %v482_v34 = vadd.f32 1.0, %v481_v26  ;;  %v931_v30 = vsel %vm808_vm0, %v930_v23, %v2996_v47  ;;  %v1359_v39 = vsel %vm1358_vm8, 1, %v2682_v5  ;;  %v927_v40 = vmul.f32 %v926_v29, %v924_v51 }
  0xf5   : > { %v1341_v60 = vadd.s32 %v1340_v28, %v1331_v33  ;;  %v1351_v45 = vshrl.u32 %v3057_v55, 16  ;;  %v1361_v59 = vadd.s32 %v1359_v39, %v1357_v58  ;;  %v492_v56 = vxor.u32 2147483648, %v475_v49 }
  0xf6   : > { %v483_v42 = vmul.f32 %v482_v34, %v3049_v27  ;;  %v1309_v3 = vsel %vm1305_vm12, %v2993_v31, %v3053_v1  ;;  %v1894_v6 = vand.u32 2139095040, %v3038_v4  ;;  %v928_v8 = vxor.u32 2147483648, %v927_v40  ;;  %v3099_v31 = vld [vmem:[%s4300_s3] ss:$0 sm:$0xff] }
  0xf7   : > { %v1353_v47 = vshrl.u32 %v3059_v35, 16  ;;  %v1360_v23 = vadd.s32 %v1356_v11, %v1352_v19  ;;  %v1362_v9 = vadd.s32 %v1361_v59, %v1351_v45  ;;  %vm491_vm9 = vcmp.eq.s32.totalorder %v3021_v38, 2 }
  0xf8   : > { %v489_v33 = vxor.u32 2147483648, %v483_v42  ;;  %v933_v27 = vsel %vm3067_vm2, 0, %v931_v30  ;;  %v1895_v55 = vshrl.u32 %v1894_v6, 23  ;;  %v929_v1 = vsel %vm808_vm0, %v928_v8, %v927_v40 }
  0xf9   : > { %v1310_v35 = vsel %vm1304_vm13, %v3044_v14, %v1309_v3  ;;  %v1363_v10 = vadd.s32 %v1362_v9, %v1353_v47  ;;  %vm1366_vm10 = vc.u32 %v1341_v60, %v1360_v23  ;;  %v493_v57 = vsel %vm491_vm9, %v492_v56, %v483_v42 }
  0xfa   : > { %v490_v62 = vsel %vm488_vm4, %v475_v49, %v489_v33  ;;  %v932_v12 = vsel %vm3067_vm2, %v2802_v21, %v929_v1  ;;  %v2518_v13 = vadd.s32 4294967169, %v1895_v55  ;;  %v950_v0 = vadd.s32 3, %v933_v27 }
  0xfb   : > { %v494_v22 = vsel %vm487_vm6, %v490_v62, %v493_v57  ;;  %v934_v16 = vmul.f32 %v932_v12, %v932_v12  ;;  %v1367_v44 = vadd.s32 1, %v1363_v10  ;;  %v1364_v14 = vmul.u32 %v2998_v53, %v1310_v35  ;;  %v304_v53 = vpop.f32.mrf.mxu0 }
  0xfc   : > { %v495_v15 = vsel %vm484_vm7, nan, %v494_v22  ;;  %v1891_v32 = vand.u32 2147483647, %v3038_v4  ;;  %v1901_v37 = vadd.s32 1, %v2518_v13  ;;  %v951_v25 = vand.u32 3, %v950_v0 }
  0xfd   : > { %v2359_v61 = vmul.f32 %v3099_v31, %v495_v15  ;;  %v935_v18 = vmul.f32 -0.001358992, %v934_v16  ;;  %v942_v36 = vmul.f32 -0.00019511016, %v934_v16  ;;  %v1368_v19 = vsel %vm1366_vm10, %v1367_v44, %v1363_v10 }
  0xfe   : > { %v1369_v7 = vadd.s32 %v1368_v19, %v1364_v14  ;;  %vm1902_vm11 = vcmp.gt.s32.totalorder %v1901_v37, 0  ;;  %v1898_v26 = vand.u32 8388607, %v1891_v32  ;;  %v3129_v49 = vadd.f32 %v2796_v17, %v304_v53 }
  0xff   : > { %2372 = vst [vmem:[%s3119_s30] sm:$0xff] %v2359_v61  ;;  %v936_v38 = vadd.f32 0.041655596, %v935_v18  ;;  %v943_v20 = vadd.f32 0.008332121, %v942_v36  ;;  %v1903_v11 = vsel %vm1902_vm11, %v1901_v37, 0  ;;  %vm956_vm12 = vcmp.eq.s32.totalorder %v951_v25, 2 }
 0x100   : > { %v1370_v24 = vadd.s32 536870912, %v1369_v7  ;;  %v1905_v29 = vand.u32 31, %v1903_v11  ;;  %vm953_vm13 = vcmp.eq.s32.totalorder %v951_v25, 0  ;;  %v3131_v39 = vadd.s32 %v1360_v23, %v1341_v60 }
 0x101   : > { %v937_v2 = vmul.f32 %v936_v38, %v934_v16  ;;  %v944_v51 = vmul.f32 %v943_v20, %v934_v16  ;;  %v1899_v45 = vor.u32 8388608, %v1898_v26  ;;  %v496_v59 = vand.u32 2147483647, %v3129_v49 }
 0x102   : > { %v3124_v28 = vshrl.u32 %v1370_v24, 30  ;;  %v3126_v58 = vsub.s32 32, %v1905_v29  ;;  %vm952_vm14 = vcmp.lt.s32.totalorder %v951_v25, 2  ;;  %v1908_v3 = vshll.u32 %v2676_v46, %v1905_v29 }
 0x103   : > { %v938_v34 = vadd.f32 -0.4999988, %v937_v2  ;;  %v945_v30 = vadd.f32 -0.16666654, %v944_v51  ;;  %vm949_vm15 = vweird.f32 %v2802_v21  ;;  %v3141_v8 = vshrl.u32 %v1903_v11, 5 }
 0x104   : > { %v1372_v40 = vshll.u32 %v3124_v28, 30  ;;  %v1909_v17 = vshrl.u32 %v2677_v48, %v3126_v58  ;;  %v1911_v60 = vshll.u32 %v2677_v48, %v1905_v29  ;;  %v1912_v47 = vshrl.u32 %v2678_v50, %v3126_v58 }
 0x105   : > { %v939_v42 = vmul.f32 %v938_v34, %v934_v16  ;;  %v946_v56 = vmul.f32 %v945_v30, %v934_v16  ;;  %v1917_v33 = vshll.u32 %v2679_v52, %v1905_v29  ;;  %v1918_v27 = vshrl.u32 %v2680_v54, %v3126_v58 }
 0x106   : > { %v3139_v6 = vsub.s32 %v1369_v7, %v1372_v40  ;;  %vm1273_vm0 = vcmp.lt.s32.totalorder %v2815_v41, 0  ;;  %v1914_v1 = vshll.u32 %v2678_v50, %v1905_v29  ;;  %v1915_v35 = vshrl.u32 %v2679_v52, %v3126_v58 }
 0x107   : > { %v940_v23 = vadd.f32 1.0, %v939_v42  ;;  %v947_v9 = vadd.f32 1.0, %v946_v56  ;;  %v3155_v57 = vor.u32 %v1909_v17, %v1908_v3  ;;  %v3157_v13 = vshll.u32 %v1899_v45, 8 }
 0x108   : > { %vm1374_vm1 = vcmp.lt.s32.totalorder %v3139_v6, 0  ;;  %v1375_v55 = vsub.s32 0, %v3139_v6  ;;  %v3160_v16 = vor.u32 %v1912_v47, %v1911_v60  ;;  %v1920_v0 = vshll.u32 %v2680_v54, %v1905_v29 }
 0x109   : > { %v948_v10 = vmul.f32 %v947_v9, %v932_v12  ;;  %v957_v62 = vxor.u32 2147483648, %v940_v23  ;;  %v1921_v44 = vshrl.u32 %v2681_v63, %v3126_v58  ;;  %v1919_v37 = vor.u32 %v1918_v27, %v1917_v33 }
 0x10a   : > { %v1376_v22 = vsel %vm1374_vm1, %v1375_v55, %v3139_v6  ;;  %vm1923_vm2 = vcmp.lt.s32.totalorder %v3141_v8, 1  ;;  %v1395_v61 = vsub.s32 4, %v3124_v28  ;;  %v1916_v18 = vor.u32 %v1915_v35, %v1914_v1 }
 0x10b   : > { %v954_v15 = vxor.u32 2147483648, %v948_v10  ;;  %v1377_v14 = vclz %v1376_v22  ;;  %v958_v12 = vsel %vm956_vm12, %v957_v62, %v948_v10  ;;  %v499_v36 = vand.u32 2139095040, %v3129_v49 }
 0x10c   : > { %vm3172_vm3 = vcmp.le.f32.partialorder %v1271_v43, 0.7853982  ;;  %vm1925_vm4 = vcmp.lt.s32.totalorder %v3141_v8, 3  ;;  %vm1926_vm5 = vcmp.lt.s32.totalorder %v3141_v8, 4  ;;  %v1922_v11 = vor.u32 %v1921_v44, %v1920_v0 }
 0x10d   : > { %v955_v19 = vsel %vm953_vm13, %v940_v23, %v954_v15  ;;  %v2507_v38 = vadd.s32 4294967294, %v1377_v14  ;;  %vm1924_vm6 = vcmp.lt.s32.totalorder %v3141_v8, 2  ;;  %v1931_v53 = vsel %vm1923_vm2, %v3155_v57, %v3160_v16 }
 0x10e   : > { %v959_v20 = vsel %vm952_vm14, %v955_v19, %v958_v12  ;;  %v1932_v24 = vsel %vm1926_vm5, %v1919_v37, 920167782  ;;  %v1940_v26 = vand.u32 65535, %v3157_v13  ;;  %v1941_v51 = vshrl.u32 %v3157_v13, 16 }
 0x10f   : > { %v960_v43 = vsel %vm949_vm15, nan, %v959_v20  ;;  %vm2508_vm7 = vcmp.lt.s32.totalorder %v2507_v38, 0  ;;  %v1933_v2 = vsel %vm1925_vm4, %v1916_v18, %v1932_v24  ;;  %v3196_v21 = vsel %vm1273_vm0, %v1395_v61, %v3124_v28 }
 0x110   : > { %v2362_v25 = vmul.f32 %v3099_v31, %v960_v43  ;;  %v1380_v29 = vsel %vm2508_vm7, 0, %v2507_v38  ;;  %v1934_v40 = vsel %vm1924_vm6, %v1931_v53, %v1933_v2  ;;  %v1935_v45 = vsel %vm1923_vm2, %v3160_v16, %v1916_v18 }
 0x111   : > { %v1381_v34 = vsub.s32 32, %v1380_v29  ;;  %v1385_v30 = vsub.s32 4294967266, %v1380_v29  ;;  %v1936_v42 = vsel %vm1926_vm5, %v1922_v11, 1326507024  ;;  %v1964_v56 = vand.u32 65535, %v1934_v40 }
 0x112   : > { %2375 = vst [vmem:[%s3119_s30 + $0x18] sm:$0xff] %v2362_v25  ;;  %v1965_v3 = vshrl.u32 %v1934_v40, 16  ;;  %v1382_v17 = vshll.u32 %v3139_v6, %v1380_v29  ;;  %v1937_v28 = vsel %vm1925_vm4, %v1919_v37, %v1936_v42  ;;  %v500_v27 = vshrl.u32 %v499_v36, 23 }
 0x113   : > { %v1383_v60 = vshrl.u32 %v3131_v39, %v1381_v34  ;;  %v1386_v47 = vadd.s32 127, %v1385_v30  ;;  %v1938_v23 = vsel %vm1924_vm6, %v1935_v45, %v1937_v28  ;;  %v1968_v33 = vmul.u32 %v1964_v56, %v1941_v51 }
 0x114   : > { %v1967_v9 = vmul.u32 %v1965_v3, %v1940_v26  ;;  %v1942_v35 = vand.u32 65535, %v1938_v23  ;;  %v1943_v10 = vshrl.u32 %v1938_v23, 16  ;;  %v1398_v6 = vsel %vm3172_vm3, 0, %v3196_v21 }
 0x115   : > { %v1384_v55 = vor.u32 %v1383_v60, %v1382_v17  ;;  %v1387_v1 = vshll.u32 %v1386_v47, 23  ;;  %v1907_v39 = vshrl.u32 %v2676_v46, %v3126_v58  ;;  %v1966_v62 = vmul.u32 %v1964_v56, %v1940_v26 }
 0x116   : > { %v1970_v22 = vshll.u32 %v1967_v9, 16  ;;  %v1928_v44 = vsel %vm1926_vm5, %v1916_v18, 2102212464  ;;  %v1945_v15 = vmul.u32 %v1943_v10, %v1940_v26  ;;  %v1969_v14 = vmul.u32 %v1965_v3, %v1941_v51 }
 0x117   : > { %v1388_v0 = vor.u32 4788187, %v1387_v1  ;;  %v1391_v37 = vcvt.s32.f32 %v1384_v55  ;;  %v1946_v12 = vmul.u32 %v1942_v35, %v1941_v51  ;;  %v1972_v61 = vshll.u32 %v1968_v33, 16 }
 0x118   : > { %vm1974_vm8 = vc.u32 %v1966_v62, %v1970_v22  ;;  %v1944_v19 = vmul.u32 %v1942_v35, %v1940_v26  ;;  %v1948_v38 = vshll.u32 %v1945_v15, 16  ;;  %v1947_v11 = vmul.u32 %v1943_v10, %v1941_v51 }
 0x119   : > { %v1389_v36 = vand.u32 2147483647, %v1388_v0  ;;  %v1975_v20 = vsel %vm1974_vm8, 1, %v2682_v5  ;;  %v1950_v53 = vshll.u32 %v1946_v12, 16  ;;  %v1976_v58 = vadd.s32 %v1970_v22, %v1966_v62 }
 0x11a   : > { %v1977_v43 = vadd.s32 %v1975_v20, %v1969_v14  ;;  %vm1952_vm9 = vc.u32 %v1944_v19, %v1948_v38  ;;  %v1954_v25 = vadd.s32 %v1948_v38, %v1944_v19  ;;  %v2491_v29 = vadd.s32 4294967169, %v500_v27 }
 0x11b   : > { %v1392_v24 = vmul.f32 %v1391_v37, %v1389_v36  ;;  %v1927_v18 = vsel %vm1923_vm2, %v1907_v39, %v3155_v57  ;;  %v1929_v2 = vsel %vm1925_vm4, %v3160_v16, %v1928_v44  ;;  %v1953_v26 = vsel %vm1952_vm9, 1, %v2682_v5 }
 0x11c   : > { %vm1978_vm10 = vc.u32 %v1976_v58, %v1972_v61  ;;  %v1955_v51 = vadd.s32 %v1953_v26, %v1947_v11  ;;  %vm1956_vm11 = vc.u32 %v1954_v25, %v1950_v53  ;;  %v1971_v40 = vshrl.u32 %v1967_v9, 16 }
 0x11d   : > { %v1393_v34 = vxor.u32 2147483648, %v1392_v24  ;;  %v1979_v30 = vsel %vm1978_vm10, 1, %v2682_v5  ;;  %v1957_v21 = vsel %vm1956_vm11, 1, %v2682_v5  ;;  %v506_v42 = vadd.s32 1, %v2491_v29 }
 0x11e   : > { %v1981_v45 = vadd.s32 %v1979_v30, %v1977_v43  ;;  %v1930_v56 = vsel %vm1924_vm6, %v1927_v18, %v1929_v2  ;;  %v1949_v16 = vshrl.u32 %v1945_v15, 16  ;;  %v1959_v3 = vadd.s32 %v1957_v21, %v1955_v51 }
 0x11f   : > { %v1394_v57 = vsel %vm1273_vm0, %v1393_v34, %v1392_v24  ;;  %v1973_v60 = vshrl.u32 %v1968_v33, 16  ;;  %vm507_vm12 = vcmp.gt.s32.totalorder %v506_v42, 0  ;;  %v1951_v23 = vshrl.u32 %v1946_v12, 16 }
 0x120   : > { %v1397_v17 = vsel %vm3172_vm3, %v2815_v41, %v1394_v57  ;;  %v1982_v47 = vadd.s32 %v1981_v45, %v1971_v40  ;;  %v1960_v9 = vadd.s32 %v1959_v3, %v1949_v16  ;;  %v508_v27 = vsel %vm507_vm12, %v506_v42, 0 }
 0x121   : > { %v1399_v28 = vmul.f32 %v1397_v17, %v1397_v17  ;;  %v3236_v55 = vadd.s32 %v1976_v58, %v1972_v61  ;;  %v510_v35 = vand.u32 31, %v508_v27  ;;  %v503_v62 = vand.u32 8388607, %v496_v59 }
 0x122   : > { %v1983_v1 = vadd.s32 %v1982_v47, %v1973_v60  ;;  %v3238_v39 = vadd.s32 %v1960_v9, %v1951_v23  ;;  %v1415_v7 = vadd.s32 3, %v1398_v6  ;;  %v1984_v33 = vmul.u32 %v3157_v13, %v1930_v56 }
 0x123   : > { %v1400_v10 = vmul.f32 -0.001358992, %v1399_v28  ;;  %v1407_v8 = vmul.f32 -0.00019511016, %v1399_v28  ;;  %v3243_v0 = vsub.s32 32, %v510_v35  ;;  %v513_v14 = vshll.u32 %v2676_v46, %v510_v35 }
 0x124   : > { %v1987_v22 = vadd.s32 1, %v1983_v1  ;;  %vm1986_vm13 = vc.u32 %v3238_v39, %v3236_v55  ;;  %v516_v61 = vshll.u32 %v2677_v48, %v510_v35  ;;  %v504_v38 = vor.u32 8388608, %v503_v62 }
 0x125   : > { %v1401_v44 = vadd.f32 0.041655596, %v1400_v10  ;;  %v1408_v15 = vadd.f32 0.008332121, %v1407_v8  ;;  %v514_v12 = vshrl.u32 %v2677_v48, %v3243_v0  ;;  %v517_v6 = vshrl.u32 %v2678_v50, %v3243_v0 }
 0x126   : > { %v1988_v37 = vsel %vm1986_vm13, %v1987_v22, %v1983_v1  ;;  %v3253_v20 = vshrl.u32 %v508_v27, 5  ;;  %v519_v11 = vshll.u32 %v2678_v50, %v510_v35  ;;  %v520_v53 = vshrl.u32 %v2679_v52, %v3243_v0 }
 0x127   : > { %v1402_v13 = vmul.f32 %v1401_v44, %v1399_v28  ;;  %v1409_v36 = vmul.f32 %v1408_v15, %v1399_v28  ;;  %v1989_v19 = vadd.s32 %v1988_v37, %v1984_v33  ;;  %v522_v58 = vshll.u32 %v2679_v52, %v510_v35 }
 0x128   : > { %v523_v29 = vshrl.u32 %v2680_v54, %v3243_v0  ;;  %v3261_v18 = vor.u32 %v514_v12, %v513_v14  ;;  %v3263_v2 = vor.u32 %v517_v6, %v516_v61  ;;  %v525_v26 = vshll.u32 %v2680_v54, %v510_v35 }
 0x129   : > { %v1403_v43 = vadd.f32 -0.4999988, %v1402_v13  ;;  %v1410_v24 = vadd.f32 -0.16666654, %v1409_v36  ;;  %v1990_v25 = vadd.s32 536870912, %v1989_v19  ;;  %v526_v34 = vshrl.u32 %v2681_v63, %v3243_v0 }
 0x12a   : > { %v524_v40 = vor.u32 %v523_v29, %v522_v58  ;;  %v1416_v45 = vand.u32 3, %v1415_v7  ;;  %v3270_v42 = vor.u32 %v520_v53, %v519_v11  ;;  %vm528_vm14 = vcmp.lt.s32.totalorder %v3253_v20, 1  ;;  %v3309_v29 = vld [vmem:[%s4299_s2] ss:$0 sm:$0xff] }
 0x12b   : > { %v1404_v51 = vmul.f32 %v1403_v43, %v1399_v28  ;;  %v1411_v30 = vmul.f32 %v1410_v24, %v1399_v28  ;;  %v3268_v21 = vshrl.u32 %v1990_v25, 30  ;;  %vm531_vm15 = vcmp.lt.s32.totalorder %v3253_v20, 4 }
 0x12c   : > { %vm530_vm0 = vcmp.lt.s32.totalorder %v3253_v20, 3  ;;  %v527_v3 = vor.u32 %v526_v34, %v525_v26  ;;  %vm529_vm1 = vcmp.lt.s32.totalorder %v3253_v20, 2  ;;  %v537_v60 = vsel %vm531_vm15, %v524_v40, 920167782 }
 0x12d   : > { %v1405_v57 = vadd.f32 1.0, %v1404_v51  ;;  %v1412_v56 = vadd.f32 1.0, %v1411_v30  ;;  %v1992_v16 = vshll.u32 %v3268_v21, 30  ;;  %v3279_v47 = vshll.u32 %v504_v38, 8  ;;  %v313_v38 = vpop.f32.mrf.mxu1 }
 0x12e   : > { %v536_v27 = vsel %vm528_vm14, %v3261_v18, %v3263_v2  ;;  %vm1417_vm2 = vcmp.lt.s32.totalorder %v1416_v45, 2  ;;  %vm1418_vm3 = vcmp.eq.s32.totalorder %v1416_v45, 0  ;;  %vm1421_vm4 = vcmp.eq.s32.totalorder %v1416_v45, 2 }
 0x12f   : > { %v1413_v28 = vmul.f32 %v1412_v56, %v1397_v17  ;;  %v1422_v23 = vxor.u32 2147483648, %v1405_v57  ;;  %v1993_v9 = vsub.s32 %v1989_v19, %v1992_v16  ;;  %v538_v1 = vsel %vm530_vm0, %v3270_v42, %v537_v60 }
 0x130   : > { %v540_v17 = vsel %vm528_vm14, %v3263_v2, %v3270_v42  ;;  %v539_v8 = vsel %vm529_vm1, %v536_v27, %v538_v1  ;;  %v541_v62 = vsel %vm531_vm15, %v527_v3, 1326507024  ;;  %v545_v7 = vand.u32 65535, %v3279_v47 }
 0x131   : > { %v1419_v35 = vxor.u32 2147483648, %v1413_v28  ;;  %vm1994_vm5 = vcmp.lt.s32.totalorder %v1993_v9, 0  ;;  %v1995_v10 = vsub.s32 0, %v1993_v9  ;;  %v546_v33 = vshrl.u32 %v3279_v47, 16 }
 0x132   : > { %v1423_v44 = vsel %vm1421_vm4, %v1422_v23, %v1413_v28  ;;  %v542_v14 = vsel %vm530_vm0, %v524_v40, %v541_v62  ;;  %vm1414_vm6 = vweird.f32 %v2815_v41  ;;  %v570_v19 = vshrl.u32 %v539_v8, 16 }
 0x133   : > { %v1420_v22 = vsel %vm1418_vm3, %v1405_v57, %v1419_v35  ;;  %v1996_v15 = vsel %vm1994_vm5, %v1995_v10, %v1993_v9  ;;  %v543_v61 = vsel %vm529_vm1, %v540_v17, %v542_v14  ;;  %v569_v58 = vand.u32 65535, %v539_v8 }
 0x134   : > { %v1424_v37 = vsel %vm1417_vm2, %v1420_v22, %v1423_v44  ;;  %v1997_v12 = vclz %v1996_v15  ;;  %v547_v13 = vand.u32 65535, %v543_v61  ;;  %v548_v36 = vshrl.u32 %v543_v61, 16 }
 0x135   : > { %v1425_v6 = vsel %vm1414_vm6, nan, %v1424_v37  ;;  %v572_v41 = vmul.u32 %v570_v19, %v545_v7  ;;  %v3312_v26 = vadd.f32 %v3309_v29, %v313_v38  ;;  %v1985_v34 = vadd.s32 %v3236_v55, %v3238_v39 }
 0x136   : > { %v2365_v11 = vmul.f32 %v3099_v31, %v1425_v6  ;;  %v2519_v53 = vadd.s32 4294967294, %v1997_v12  ;;  %v549_v43 = vmul.u32 %v547_v13, %v545_v7  ;;  %v550_v24 = vmul.u32 %v548_v36, %v545_v7 }
 0x137   : > { %v551_v25 = vmul.u32 %v547_v13, %v546_v33  ;;  %v552_v56 = vmul.u32 %v548_v36, %v546_v33  ;;  %v571_v16 = vmul.u32 %v569_v58, %v545_v7  ;;  %v573_v28 = vmul.u32 %v569_v58, %v546_v33 }
 0x138   : > { %2378 = vst [vmem:[%s3119_s30 + $0x30] sm:$0xff] %v2365_v11  ;;  %vm2520_vm7 = vcmp.lt.s32.totalorder %v2519_v53, 0  ;;  %v553_v30 = vshll.u32 %v550_v24, 16  ;;  %vm1893_vm9 = vcmp.lt.s32.totalorder %v3038_v4, 0  ;;  %v575_v35 = vshll.u32 %v572_v41, 16 }
 0x139   : > { %v2000_v51 = vsel %vm2520_vm7, 0, %v2519_v53  ;;  %v555_v40 = vshll.u32 %v551_v25, 16  ;;  %v512_v55 = vshrl.u32 %v2676_v46, %v3243_v0  ;;  %v577_v10 = vshll.u32 %v573_v28, 16 }
 0x13a   : > { %v2001_v45 = vsub.s32 32, %v2000_v51  ;;  %v2005_v57 = vsub.s32 4294967266, %v2000_v51  ;;  %v2002_v3 = vshll.u32 %v1993_v9, %v2000_v51  ;;  %vm557_vm8 = vc.u32 %v549_v43, %v553_v30 }
 0x13b   : > { %v559_v60 = vadd.s32 %v553_v30, %v549_v43  ;;  %v558_v1 = vsel %vm557_vm8, 1, %v2682_v5  ;;  %v554_v62 = vshrl.u32 %v550_v24, 16  ;;  %v574_v22 = vmul.u32 %v570_v19, %v546_v33 }
 0x13c   : > { %v2003_v23 = vshrl.u32 %v1985_v34, %v2001_v45  ;;  %v2006_v27 = vadd.s32 127, %v2005_v57  ;;  %v560_v39 = vadd.s32 %v558_v1, %v552_v56  ;;  %vm579_vm11 = vc.u32 %v571_v16, %v575_v35 }
 0x13d   : > { %vm561_vm10 = vc.u32 %v559_v60, %v555_v40  ;;  %v581_v44 = vadd.s32 %v575_v35, %v571_v16  ;;  %v2015_v14 = vsub.s32 4, %v3268_v21  ;;  %v533_v37 = vsel %vm531_vm15, %v3270_v42, 2102212464 }
 0x13e   : > { %v2004_v17 = vor.u32 %v2003_v23, %v2002_v3  ;;  %v2007_v8 = vshll.u32 %v2006_v27, 23  ;;  %v562_v9 = vsel %vm561_vm10, 1, %v2682_v5  ;;  %v580_v0 = vsel %vm579_vm11, 1, %v2682_v5 }
 0x13f   : > { %v564_v7 = vadd.s32 %v562_v9, %v560_v39  ;;  %v556_v12 = vshrl.u32 %v551_v25, 16  ;;  %v582_v6 = vadd.s32 %v580_v0, %v574_v22  ;;  %vm583_vm12 = vc.u32 %v581_v44, %v577_v10 }
 0x140   : > { %v2008_v15 = vor.u32 4788187, %v2007_v8  ;;  %v2011_v36 = vcvt.s32.f32 %v2004_v17  ;;  %v584_v38 = vsel %vm583_vm12, 1, %v2682_v5  ;;  %v964_v33 = vand.u32 2139095040, %v3312_v26 }
 0x141   : > { %v565_v61 = vadd.s32 %v564_v7, %v554_v62  ;;  %v532_v19 = vsel %vm528_vm14, %v512_v55, %v3261_v18  ;;  %v576_v11 = vshrl.u32 %v572_v41, 16  ;;  %v586_v53 = vadd.s32 %v584_v38, %v582_v6  ;;  %v322_v41 = vpop.f32.mrf.mxu2 }
 0x142   : > { %v2009_v13 = vand.u32 2147483647, %v2008_v15  ;;  %v961_v42 = vand.u32 2147483647, %v3312_v26  ;;  %v534_v43 = vsel %vm530_vm0, %v3263_v2, %v533_v37  ;;  %v965_v25 = vshrl.u32 %v964_v33, 23 }
 0x143   : > { %v566_v24 = vadd.s32 %v565_v61, %v556_v12  ;;  %v2016_v34 = vsel %vm1893_vm9, %v2015_v14, %v3268_v21  ;;  %v578_v51 = vshrl.u32 %v573_v28, 16  ;;  %v587_v30 = vadd.s32 %v586_v53, %v576_v11 }
 0x144   : > { %v2012_v58 = vmul.f32 %v2011_v36, %v2009_v13  ;;  %v585_v45 = vadd.s32 %v581_v44, %v577_v10  ;;  %v2500_v18 = vadd.s32 4294967169, %v965_v25  ;;  %vm1892_vm13 = vcmp.le.f32.partialorder %v1891_v32, 0.7853982 }
 0x145   : > { %v535_v57 = vsel %vm529_vm1, %v532_v19, %v534_v43  ;;  %v588_v56 = vadd.s32 %v587_v30, %v578_v51  ;;  %v968_v2 = vand.u32 8388607, %v961_v42  ;;  %v2018_v21 = vsel %vm1892_vm13, 0, %v2016_v34 }
 0x146   : > { %v2013_v40 = vxor.u32 2147483648, %v2012_v58  ;;  %vm591_vm14 = vc.u32 %v566_v24, %v585_v45  ;;  %v971_v3 = vadd.s32 1, %v2500_v18  ;;  %v3348_v23 = vadd.f32 %v3309_v29, %v322_v41 }
 0x147   : > { %v592_v28 = vadd.s32 1, %v588_v56  ;;  %v589_v20 = vmul.u32 %v3279_v47, %v535_v57  ;;  %v2035_v27 = vadd.s32 3, %v2018_v21  ;;  %v969_v35 = vor.u32 8388608, %v968_v2 }
 0x148   : > { %v2014_v16 = vsel %vm1893_vm9, %v2013_v40, %v2012_v58  ;;  %vm972_vm15 = vcmp.gt.s32.totalorder %v971_v3, 0  ;;  %v1426_v62 = vand.u32 2147483647, %v3348_v23  ;;  %v3354_v15 = vadd.s32 %v585_v45, %v566_v24 }
 0x149   : > { %v2017_v60 = vsel %vm1892_vm13, %v3038_v4, %v2014_v16  ;;  %v593_v1 = vsel %vm591_vm14, %v592_v28, %v588_v56  ;;  %v973_v55 = vsel %vm972_vm15, %v971_v3, 0  ;;  %v3352_v44 = vand.u32 3, %v2035_v27 }
 0x14a   : > { %v2019_v32 = vmul.f32 %v2017_v60, %v2017_v60  ;;  %v594_v17 = vadd.s32 %v593_v1, %v589_v20  ;;  %v975_v8 = vand.u32 31, %v973_v55  ;;  %v3356_v47 = vshll.u32 %v969_v35, 8 }
 0x14b   : > { %v1429_v61 = vand.u32 2139095040, %v3348_v23  ;;  %v3361_v6 = vshrl.u32 %v973_v55, 5  ;;  %v3367_v38 = vand.u32 8388607, %v1426_v62  ;;  %vm2038_vm0 = vcmp.eq.s32.totalorder %v3352_v44, 0 }
 0x14c   : > { %v2020_v39 = vmul.f32 -0.001358992, %v2019_v32  ;;  %v2027_v10 = vmul.f32 -0.00019511016, %v2019_v32  ;;  %v595_v22 = vadd.s32 536870912, %v594_v17  ;;  %v976_v14 = vsub.s32 32, %v975_v8 }
 0x14d   : > { %v978_v13 = vshll.u32 %v2676_v46, %v975_v8  ;;  %v981_v36 = vshll.u32 %v2677_v48, %v975_v8  ;;  %v984_v53 = vshll.u32 %v2678_v50, %v975_v8  ;;  %vm2041_vm1 = vcmp.eq.s32.totalorder %v3352_v44, 2 }
 0x14e   : > { %v2021_v9 = vadd.f32 0.041655596, %v2020_v39  ;;  %v2028_v7 = vadd.f32 0.008332121, %v2027_v10  ;;  %v3358_v12 = vshrl.u32 %v595_v22, 30  ;;  %v979_v58 = vshrl.u32 %v2677_v48, %v976_v14 }
 0x14f   : > { %v982_v43 = vshrl.u32 %v2678_v50, %v976_v14  ;;  %v985_v24 = vshrl.u32 %v2679_v52, %v976_v14  ;;  %v987_v25 = vshll.u32 %v2679_v52, %v975_v8  ;;  %vm2037_vm2 = vcmp.lt.s32.totalorder %v3352_v44, 2 }
 0x150   : > { %v2022_v37 = vmul.f32 %v2021_v9, %v2019_v32  ;;  %v2029_v0 = vmul.f32 %v2028_v7, %v2019_v32  ;;  %v597_v11 = vshll.u32 %v3358_v12, 30  ;;  %v988_v40 = vshrl.u32 %v2680_v54, %v976_v14 }
 0x151   : > { %vm2034_vm3 = vweird.f32 %v3038_v4  ;;  %v990_v45 = vshll.u32 %v2680_v54, %v975_v8  ;;  %v991_v18 = vshrl.u32 %v2681_v63, %v976_v14  ;;  %vm993_vm4 = vcmp.lt.s32.totalorder %v3361_v6, 1 }
 0x152   : > { %v2023_v33 = vadd.f32 -0.4999988, %v2022_v37  ;;  %v2030_v19 = vadd.f32 -0.16666654, %v2029_v0  ;;  %v3378_v30 = vsub.s32 %v594_v17, %v597_v11  ;;  %v1010_v41 = vand.u32 65535, %v3356_v47 }
 0x153   : > { %v977_v16 = vshrl.u32 %v2676_v46, %v976_v14  ;;  %v980_v21 = vor.u32 %v979_v58, %v978_v13  ;;  %v983_v3 = vor.u32 %v982_v43, %v981_v36  ;;  %v986_v28 = vor.u32 %v985_v24, %v984_v53 }
 0x154   : > { %v2024_v34 = vmul.f32 %v2023_v33, %v2019_v32  ;;  %v2031_v51 = vmul.f32 %v2030_v19, %v2019_v32  ;;  %vm599_vm5 = vcmp.lt.s32.totalorder %v3378_v30, 0  ;;  %v600_v2 = vsub.s32 0, %v3378_v30 }
 0x155   : > { %v989_v1 = vor.u32 %v988_v40, %v987_v25  ;;  %v992_v55 = vor.u32 %v991_v18, %v990_v45  ;;  %vm996_vm6 = vcmp.lt.s32.totalorder %v3361_v6, 4  ;;  %v1011_v39 = vshrl.u32 %v3356_v47, 16 }
 0x156   : > { %v2025_v57 = vadd.f32 1.0, %v2024_v34  ;;  %v2032_v56 = vadd.f32 1.0, %v2031_v51  ;;  %v601_v27 = vsel %vm599_vm5, %v600_v2, %v3378_v30  ;;  %v620_v17 = vsub.s32 4, %v3358_v12 }
 0x157   : > { %v602_v35 = vclz %v601_v27  ;;  %vm995_vm7 = vcmp.lt.s32.totalorder %v3361_v6, 3  ;;  %v1430_v8 = vshrl.u32 %v1429_v61, 23  ;;  %vm498_vm8 = vcmp.lt.s32.totalorder %v3129_v49, 0 }
 0x158   : > { %v2033_v32 = vmul.f32 %v2032_v56, %v2017_v60  ;;  %v2042_v20 = vxor.u32 2147483648, %v2025_v57  ;;  %vm994_vm9 = vcmp.lt.s32.totalorder %v3361_v6, 2  ;;  %v997_v60 = vsel %vm993_vm4, %v977_v16, %v980_v21 }
 0x159   : > { %v2492_v9 = vadd.s32 4294967294, %v602_v35  ;;  %v1001_v7 = vsel %vm993_vm4, %v980_v21, %v983_v3  ;;  %v1002_v37 = vsel %vm996_vm6, %v989_v1, 920167782  ;;  %v1005_v0 = vsel %vm993_vm4, %v983_v3, %v986_v28 }
 0x15a   : > { %v2039_v10 = vxor.u32 2147483648, %v2033_v32  ;;  %v2043_v14 = vsel %vm2041_vm1, %v2042_v20, %v2033_v32  ;;  %v1003_v13 = vsel %vm995_vm7, %v986_v28, %v1002_v37  ;;  %v1006_v36 = vsel %vm996_vm6, %v992_v55, 1326507024 }
 0x15b   : > { %vm2493_vm10 = vcmp.lt.s32.totalorder %v2492_v9, 0  ;;  %v1004_v11 = vsel %vm994_vm9, %v1001_v7, %v1003_v13  ;;  %v1007_v53 = vsel %vm995_vm7, %v989_v1, %v1006_v36  ;;  %v998_v24 = vsel %vm996_vm6, %v986_v28, 2102212464 }
 0x15c   : > { %v2040_v22 = vsel %vm2038_vm0, %v2025_v57, %v2039_v10  ;;  %v605_v19 = vsel %vm2493_vm10, 0, %v2492_v9  ;;  %v1008_v4 = vsel %vm994_vm9, %v1005_v0, %v1007_v53  ;;  %v1034_v34 = vand.u32 65535, %v1004_v11 }
 0x15d   : > { %v2044_v61 = vsel %vm2037_vm2, %v2040_v22, %v2043_v14  ;;  %v606_v58 = vsub.s32 32, %v605_v19  ;;  %v610_v43 = vsub.s32 4294967266, %v605_v19  ;;  %v607_v25 = vshll.u32 %v3378_v30, %v605_v19 }
 0x15e   : > { %v2045_v33 = vsel %vm2034_vm3, nan, %v2044_v61  ;;  %v1035_v51 = vshrl.u32 %v1004_v11, 16  ;;  %v1012_v18 = vand.u32 65535, %v1008_v4  ;;  %v1013_v57 = vshrl.u32 %v1008_v4, 16 }
 0x15f   : > { %v2369_v44 = vmul.f32 %v3099_v31, %v2045_v33  ;;  %v608_v40 = vshrl.u32 %v3354_v15, %v606_v58  ;;  %v611_v45 = vadd.s32 127, %v610_v43  ;;  %v999_v31 = vsel %vm995_vm7, %v983_v3, %v998_v24 }
 0x160   : > { %v1036_v56 = vmul.u32 %v1034_v34, %v1010_v41  ;;  %v1037_v2 = vmul.u32 %v1035_v51, %v1010_v41  ;;  %v1038_v16 = vmul.u32 %v1034_v34, %v1011_v39  ;;  %vm3432_vm11 = vcmp.le.f32.partialorder %v496_v59, 0.7853982 }
 0x161   : > { %2382 = vst [vmem:[%s3119_s30 + $0x50] sm:$0xff] %v2369_v44  ;;  %v609_v21 = vor.u32 %v608_v40, %v607_v25  ;;  %v612_v28 = vshll.u32 %v611_v45, 23  ;;  %v1014_v32 = vmul.u32 %v1012_v18, %v1010_v41  ;;  %v1015_v20 = vmul.u32 %v1013_v57, %v1010_v41 }
 0x162   : > { %v3439_v15 = vsel %vm498_vm8, %v620_v17, %v3358_v12  ;;  %v1016_v27 = vmul.u32 %v1012_v18, %v1011_v39  ;;  %v1040_v3 = vshll.u32 %v1037_v2, 16  ;;  %v2509_v1 = vadd.s32 4294967169, %v1430_v8 }
 0x163   : > { %v613_v35 = vor.u32 4788187, %v612_v28  ;;  %v3443_v55 = vsel %vm994_vm9, %v997_v60, %v999_v31  ;;  %v1018_v59 = vshll.u32 %v1015_v20, 16  ;;  %v1039_v10 = vmul.u32 %v1035_v51, %v1011_v39 }
 0x164   : > { %v616_v9 = vcvt.s32.f32 %v609_v21  ;;  %v1017_v7 = vmul.u32 %v1013_v57, %v1011_v39  ;;  %v1020_v22 = vshll.u32 %v1016_v27, 16  ;;  %v1042_v14 = vshll.u32 %v1038_v16, 16 }
 0x165   : > { %v614_v41 = vand.u32 2147483647, %v613_v35  ;;  %vm1022_vm12 = vc.u32 %v1014_v32, %v1018_v59  ;;  %v1024_v37 = vadd.s32 %v1018_v59, %v1014_v32  ;;  %vm1044_vm13 = vc.u32 %v1036_v56, %v1040_v3 }
 0x166   : > { %v1023_v12 = vsel %vm1022_vm12, 1, %v2682_v5  ;;  %v1045_v17 = vsel %vm1044_vm13, 1, %v2682_v5  ;;  %v1046_v8 = vadd.s32 %v1040_v3, %v1036_v56  ;;  %v1436_v0 = vadd.s32 1, %v2509_v1 }
 0x167   : > { %v617_v61 = vmul.f32 %v616_v9, %v614_v41  ;;  %v1025_v6 = vadd.s32 %v1023_v12, %v1017_v7  ;;  %vm1026_vm14 = vc.u32 %v1024_v37, %v1020_v22  ;;  %v1047_v60 = vadd.s32 %v1045_v17, %v1039_v10 }
 0x168   : > { %v1019_v13 = vshrl.u32 %v1015_v20, 16  ;;  %v1027_v36 = vsel %vm1026_vm14, 1, %v2682_v5  ;;  %vm1048_vm15 = vc.u32 %v1046_v8, %v1042_v14  ;;  %vm1437_vm0 = vcmp.gt.s32.totalorder %v1436_v0, 0 }
 0x169   : > { %v618_v39 = vxor.u32 2147483648, %v617_v61  ;;  %v1029_v33 = vadd.s32 %v1027_v36, %v1025_v6  ;;  %v1049_v19 = vsel %vm1048_vm15, 1, %v2682_v5  ;;  %v1438_v11 = vsel %vm1437_vm0, %v1436_v0, 0 }
 0x16a   : > { %v623_v53 = vsel %vm3432_vm11, 0, %v3439_v15  ;;  %v1041_v44 = vshrl.u32 %v1037_v2, 16  ;;  %v1051_v58 = vadd.s32 %v1049_v19, %v1047_v60  ;;  %v1440_v43 = vand.u32 31, %v1438_v11 }
 0x16b   : > { %v619_v24 = vsel %vm498_vm8, %v618_v39, %v617_v61  ;;  %v1021_v25 = vshrl.u32 %v1016_v27, 16  ;;  %v1030_v4 = vadd.s32 %v1029_v33, %v1019_v13  ;;  %v1054_v34 = vmul.u32 %v3356_v47, %v3443_v55 }
 0x16c   : > { %v622_v51 = vsel %vm3432_vm11, %v3129_v49, %v619_v24  ;;  %v1043_v40 = vshrl.u32 %v1038_v16, 16  ;;  %v1052_v45 = vadd.s32 %v1051_v58, %v1041_v44  ;;  %v3459_v18 = vsub.s32 32, %v1440_v43 }
 0x16d   : > { %v624_v57 = vmul.f32 %v622_v51, %v622_v51  ;;  %v3461_v31 = vadd.s32 %v1030_v4, %v1021_v25  ;;  %v3463_v56 = vadd.s32 %v1046_v8, %v1042_v14  ;;  %v3465_v2 = vshrl.u32 %v1438_v11, 5 }
 0x16e   : > { %v1053_v21 = vadd.s32 %v1052_v45, %v1043_v40  ;;  %v1443_v28 = vshll.u32 %v2676_v46, %v1440_v43  ;;  %v1444_v47 = vshrl.u32 %v2677_v48, %v3459_v18  ;;  %v1447_v30 = vshrl.u32 %v2678_v50, %v3459_v18 }
 0x16f   : > { %v625_v16 = vmul.f32 -0.001358992, %v624_v57  ;;  %v632_v32 = vmul.f32 -0.00019511016, %v624_v57  ;;  %vm1056_vm1 = vc.u32 %v3461_v31, %v3463_v56  ;;  %v1446_v20 = vshll.u32 %v2677_v48, %v1440_v43 }
 0x170   : > { %v1057_v15 = vadd.s32 1, %v1053_v21  ;;  %v3475_v27 = vor.u32 %v1444_v47, %v1443_v28  ;;  %v1449_v3 = vshll.u32 %v2678_v50, %v1440_v43  ;;  %v1450_v1 = vshrl.u32 %v2679_v52, %v3459_v18 }
 0x171   : > { %v626_v35 = vadd.f32 0.041655596, %v625_v16  ;;  %v633_v55 = vadd.f32 0.008332121, %v632_v32  ;;  %v1452_v59 = vshll.u32 %v2679_v52, %v1440_v43  ;;  %v1453_v10 = vshrl.u32 %v2680_v54, %v3459_v18 }
 0x172   : > { %v1058_v9 = vsel %vm1056_vm1, %v1057_v15, %v1053_v21  ;;  %v3483_v7 = vor.u32 %v1447_v30, %v1446_v20  ;;  %v1455_v22 = vshll.u32 %v2680_v54, %v1440_v43  ;;  %v1456_v14 = vshrl.u32 %v2681_v63, %v3459_v18 }
 0x173   : > { %v627_v41 = vmul.f32 %v626_v35, %v624_v57  ;;  %v634_v37 = vmul.f32 %v633_v55, %v624_v57  ;;  %v1059_v12 = vadd.s32 %v1058_v9, %v1054_v34  ;;  %v1454_v17 = vor.u32 %v1453_v10, %v1452_v59  ;;  %v334_v35 = vpop.f32.mrf.mxu3 }
 0x174   : > { %v640_v8 = vadd.s32 3, %v623_v53  ;;  %v1451_v0 = vor.u32 %v1450_v1, %v1449_v3  ;;  %v1457_v61 = vor.u32 %v1456_v14, %v1455_v22  ;;  %vm1461_vm2 = vcmp.lt.s32.totalorder %v3465_v2, 4 }
 0x175   : > { %v628_v6 = vadd.f32 -0.4999988, %v627_v41  ;;  %v635_v60 = vadd.f32 -0.16666654, %v634_v37  ;;  %v1060_v13 = vadd.s32 536870912, %v1059_v12  ;;  %v1434_v36 = vor.u32 8388608, %v3367_v38 }
 0x176   : > { %vm1458_vm3 = vcmp.lt.s32.totalorder %v3465_v2, 1  ;;  %vm1460_vm4 = vcmp.lt.s32.totalorder %v3465_v2, 3  ;;  %v1467_v39 = vsel %vm1461_vm2, %v1454_v17, 920167782  ;;  %v641_v44 = vand.u32 3, %v640_v8 }
 0x177   : > { %v629_v33 = vmul.f32 %v628_v6, %v624_v57  ;;  %v636_v19 = vmul.f32 %v635_v60, %v624_v57  ;;  %v3494_v11 = vshrl.u32 %v1060_v13, 30  ;;  %v1466_v53 = vsel %vm1458_vm3, %v3475_v27, %v3483_v7  ;;  %v3527_v8 = vld [vmem:[%s4300_s3] ss:$0 sm:$0xff] }
 0x178   : > { %vm1459_vm5 = vcmp.lt.s32.totalorder %v3465_v2, 2  ;;  %v1468_v38 = vsel %vm1460_vm4, %v1451_v0, %v1467_v39  ;;  %v1471_v58 = vsel %vm1461_vm2, %v1457_v61, 1326507024  ;;  %v1470_v4 = vsel %vm1458_vm3, %v3483_v7, %v1451_v0 }
 0x179   : > { %v630_v43 = vadd.f32 1.0, %v629_v33  ;;  %v637_v24 = vadd.f32 1.0, %v636_v19  ;;  %v1062_v25 = vshll.u32 %v3494_v11, 30  ;;  %v1469_v34 = vsel %vm1459_vm5, %v1466_v53, %v1468_v38 }
 0x17a   : > { %v1472_v40 = vsel %vm1460_vm4, %v1454_v17, %v1471_v58  ;;  %v3513_v45 = vshll.u32 %v1434_v36, 8  ;;  %vm642_vm6 = vcmp.lt.s32.totalorder %v641_v44, 2  ;;  %vm643_vm7 = vcmp.eq.s32.totalorder %v641_v44, 0 }
 0x17b   : > { %v638_v57 = vmul.f32 %v637_v24, %v622_v51  ;;  %v647_v21 = vxor.u32 2147483648, %v630_v43  ;;  %v1063_v28 = vsub.s32 %v1059_v12, %v1062_v25  ;;  %v1473_v47 = vsel %vm1459_vm5, %v1470_v4, %v1472_v40 }
 0x17c   : > { %v1500_v30 = vshrl.u32 %v1469_v34, 16  ;;  %vm646_vm8 = vcmp.eq.s32.totalorder %v641_v44, 2  ;;  %v1475_v20 = vand.u32 65535, %v3513_v45  ;;  %v1476_v15 = vshrl.u32 %v3513_v45, 16 }
 0x17d   : > { %v644_v16 = vxor.u32 2147483648, %v638_v57  ;;  %vm1064_vm9 = vcmp.lt.s32.totalorder %v1063_v28, 0  ;;  %v1065_v32 = vsub.s32 0, %v1063_v28  ;;  %v1477_v3 = vand.u32 65535, %v1473_v47 }
 0x17e   : > { %v1478_v1 = vshrl.u32 %v1473_v47, 16  ;;  %v648_v55 = vsel %vm646_vm8, %v647_v21, %v638_v57  ;;  %v1499_v10 = vand.u32 65535, %v1469_v34  ;;  %vm639_vm10 = vweird.f32 %v3129_v49 }
 0x17f   : > { %v645_v51 = vsel %vm643_vm7, %v630_v43, %v644_v16  ;;  %v1066_v59 = vsel %vm1064_vm9, %v1065_v32, %v1063_v28  ;;  %v1502_v14 = vmul.u32 %v1500_v30, %v1475_v20  ;;  %v1481_v12 = vmul.u32 %v1477_v3, %v1476_v15 }
 0x180   : > { %v649_v9 = vsel %vm642_vm6, %v645_v51, %v648_v55  ;;  %v1067_v22 = vclz %v1066_v59  ;;  %v1480_v37 = vmul.u32 %v1478_v1, %v1475_v20  ;;  %v3522_v17 = vadd.f32 %v3309_v29, %v334_v35 }
 0x181   : > { %v650_v41 = vsel %vm639_vm10, nan, %v649_v9  ;;  %v1055_v49 = vadd.s32 %v3463_v56, %v3461_v31  ;;  %v1442_v60 = vshrl.u32 %v2676_v46, %v3459_v18  ;;  %v1463_v13 = vsel %vm1461_vm2, %v1451_v0, 2102212464 }
 0x182   : > { %v2360_v61 = vmul.f32 %v3527_v8, %v650_v41  ;;  %v2501_v6 = vadd.s32 4294967294, %v1067_v22  ;;  %v1479_v36 = vmul.u32 %v1477_v3, %v1475_v20  ;;  %v1483_v39 = vshll.u32 %v1480_v37, 16 }
 0x183   : > { %v1501_v33 = vmul.u32 %v1499_v10, %v1475_v20  ;;  %v1482_v19 = vmul.u32 %v1478_v1, %v1476_v15  ;;  %v1503_v53 = vmul.u32 %v1499_v10, %v1476_v15  ;;  %v1505_v44 = vshll.u32 %v1502_v14, 16 }
 0x184   : > { %2373 = vst [vmem:[%s3119_s30 + $0x8] sm:$0xff] %v2360_v61  ;;  %vm2502_vm11 = vcmp.lt.s32.totalorder %v2501_v6, 0  ;;  %v1485_v58 = vshll.u32 %v1481_v12, 16  ;;  %vm1487_vm12 = vc.u32 %v1479_v36, %v1483_v39  ;;  %v1489_v43 = vadd.s32 %v1483_v39, %v1479_v36 }
 0x185   : > { %v1070_v38 = vsel %vm2502_vm11, 0, %v2501_v6  ;;  %v1484_v24 = vshrl.u32 %v1480_v37, 16  ;;  %v1488_v18 = vsel %vm1487_vm12, 1, %v2682_v5  ;;  %v1504_v0 = vmul.u32 %v1500_v30, %v1476_v15 }
 0x186   : > { %v1071_v31 = vsub.s32 32, %v1070_v38  ;;  %v1075_v56 = vsub.s32 4294967266, %v1070_v38  ;;  %v1072_v25 = vshll.u32 %v1063_v28, %v1070_v38  ;;  %v1490_v4 = vadd.s32 %v1488_v18, %v1482_v19  ;;  %v307_v38 = vpop.f32.mrf.mxu0 }
 0x187   : > { %vm1491_vm13 = vc.u32 %v1489_v43, %v1485_v58  ;;  %vm1509_vm14 = vc.u32 %v1501_v33, %v1505_v44  ;;  %v1507_v47 = vshll.u32 %v1503_v53, 16  ;;  %v1511_v32 = vadd.s32 %v1505_v44, %v1501_v33 }
 0x188   : > { %v1073_v34 = vshrl.u32 %v1055_v49, %v1071_v31  ;;  %v1076_v40 = vadd.s32 127, %v1075_v56  ;;  %v1492_v57 = vsel %vm1491_vm13, 1, %v2682_v5  ;;  %v1510_v16 = vsel %vm1509_vm14, 1, %v2682_v5 }
 0x189   : > { %v1494_v21 = vadd.s32 %v1492_v57, %v1490_v4  ;;  %v1085_v1 = vsub.s32 4, %v3494_v11  ;;  %v1512_v35 = vadd.s32 %v1510_v16, %v1504_v0  ;;  %vm963_vm15 = vcmp.lt.s32.totalorder %v3312_v26, 0 }
 0x18a   : > { %v1074_v20 = vor.u32 %v1073_v34, %v1072_v25  ;;  %v1077_v3 = vshll.u32 %v1076_v40, 23  ;;  %vm1513_vm0 = vc.u32 %v1511_v32, %v1507_v47  ;;  %v1462_v15 = vsel %vm1458_vm3, %v1442_v60, %v3475_v27 }
 0x18b   : > { %v1495_v28 = vadd.s32 %v1494_v21, %v1484_v24  ;;  %v1486_v51 = vshrl.u32 %v1481_v12, 16  ;;  %v1514_v55 = vsel %vm1513_vm0, 1, %v2682_v5  ;;  %v1464_v59 = vsel %vm1460_vm4, %v3483_v7, %v1463_v13 }
 0x18c   : > { %v1078_v30 = vor.u32 4788187, %v1077_v3  ;;  %v1506_v10 = vshrl.u32 %v1502_v14, 16  ;;  %v1516_v9 = vadd.s32 %v1514_v55, %v1512_v35  ;;  %v2049_v22 = vand.u32 2139095040, %v3522_v17 }
 0x18d   : > { %v1081_v37 = vcvt.s32.f32 %v1074_v20  ;;  %v1086_v61 = vsel %vm963_vm15, %v1085_v1, %v3494_v11  ;;  %v1496_v49 = vadd.s32 %v1495_v28, %v1486_v51  ;;  %v1508_v6 = vshrl.u32 %v1503_v53, 16 }
 0x18e   : > { %v1079_v41 = vand.u32 2147483647, %v1078_v30  ;;  %v1517_v27 = vadd.s32 %v1516_v9, %v1506_v10  ;;  %v2046_v12 = vand.u32 2147483647, %v3522_v17  ;;  %v2050_v60 = vshrl.u32 %v2049_v22, 23 }
 0x18f   : > { %v1515_v39 = vadd.s32 %v1511_v32, %v1507_v47  ;;  %vm962_vm1 = vcmp.le.f32.partialorder %v961_v42, 0.7853982  ;;  %v1465_v7 = vsel %vm1459_vm5, %v1462_v15, %v1464_v59  ;;  %v3565_v25 = vadd.f32 %v3309_v29, %v307_v38 }
 0x190   : > { %v1082_v36 = vmul.f32 %v1081_v37, %v1079_v41  ;;  %v1518_v14 = vadd.s32 %v1517_v27, %v1508_v6  ;;  %v2521_v13 = vadd.s32 4294967169, %v2050_v60  ;;  %v1088_v19 = vsel %vm962_vm1, 0, %v1086_v61 }
 0x191   : > { %vm1521_vm2 = vc.u32 %v1496_v49, %v1515_v39  ;;  %v2053_v53 = vand.u32 8388607, %v2046_v12  ;;  %v1519_v43 = vmul.u32 %v3513_v45, %v1465_v7  ;;  %v1105_v2 = vadd.s32 3, %v1088_v19 }
 0x192   : > { %v1083_v33 = vxor.u32 2147483648, %v1082_v36  ;;  %v1522_v11 = vadd.s32 1, %v1518_v14  ;;  %v2056_v44 = vadd.s32 1, %v2521_v13  ;;  %v3569_v47 = vadd.s32 %v1515_v39, %v1496_v49 }
 0x193   : > { %v2054_v4 = vor.u32 8388608, %v2053_v53  ;;  %v3567_v21 = vand.u32 3, %v1105_v2  ;;  %v651_v16 = vand.u32 2147483647, %v3565_v25  ;;  %v654_v1 = vand.u32 2139095040, %v3565_v25 }
 0x194   : > { %v1084_v58 = vsel %vm963_vm15, %v1083_v33, %v1082_v36  ;;  %v1523_v31 = vsel %vm1521_vm2, %v1522_v11, %v1518_v14  ;;  %vm2057_vm3 = vcmp.gt.s32.totalorder %v2056_v44, 0  ;;  %vm1104_vm8 = vweird.f32 %v3312_v26 }
 0x195   : > { %v1087_v42 = vsel %vm962_vm1, %v3312_v26, %v1084_v58  ;;  %v1524_v24 = vadd.s32 %v1523_v31, %v1519_v43  ;;  %v2058_v18 = vsel %vm2057_vm3, %v2056_v44, 0  ;;  %v3578_v30 = vshll.u32 %v2054_v4, 8 }
 0x196   : > { %v1089_v56 = vmul.f32 %v1087_v42, %v1087_v42  ;;  %v2060_v0 = vand.u32 31, %v2058_v18  ;;  %vm1111_vm4 = vcmp.eq.s32.totalorder %v3567_v21, 2  ;;  %v3589_v6 = vshrl.u32 %v2058_v18, 5 }
 0x197   : > { %v1525_v57 = vadd.s32 536870912, %v1524_v24  ;;  %vm1108_vm5 = vcmp.eq.s32.totalorder %v3567_v21, 0  ;;  %v3595_v36 = vand.u32 65535, %v3578_v30  ;;  %v655_v39 = vshrl.u32 %v654_v1, 23 }
 0x198   : > { %v1090_v34 = vmul.f32 -0.001358992, %v1089_v56  ;;  %v1097_v40 = vmul.f32 -0.00019511016, %v1089_v56  ;;  %v2061_v45 = vsub.s32 32, %v2060_v0  ;;  %v2063_v29 = vshll.u32 %v2676_v46, %v2060_v0 }
 0x199   : > { %v3572_v3 = vshrl.u32 %v1525_v57, 30  ;;  %v2066_v35 = vshll.u32 %v2677_v48, %v2060_v0  ;;  %v2069_v28 = vshll.u32 %v2678_v50, %v2060_v0  ;;  %v2072_v59 = vshll.u32 %v2679_v52, %v2060_v0 }
 0x19a   : > { %v1091_v32 = vadd.f32 0.041655596, %v1090_v34  ;;  %v1098_v20 = vadd.f32 0.008332121, %v1097_v40  ;;  %v2064_v10 = vshrl.u32 %v2677_v48, %v2061_v45  ;;  %v2067_v9 = vshrl.u32 %v2678_v50, %v2061_v45 }
 0x19b   : > { %v1527_v55 = vshll.u32 %v3572_v3, 30  ;;  %v2070_v22 = vshrl.u32 %v2679_v52, %v2061_v45  ;;  %v2073_v41 = vshrl.u32 %v2680_v54, %v2061_v45  ;;  %v2075_v27 = vshll.u32 %v2680_v54, %v2060_v0 }
 0x19c   : > { %v1092_v15 = vmul.f32 %v1091_v32, %v1089_v56  ;;  %v1099_v51 = vmul.f32 %v1098_v20, %v1089_v56  ;;  %v2076_v60 = vshrl.u32 %v2681_v63, %v2061_v45  ;;  %vm1107_vm6 = vcmp.lt.s32.totalorder %v3567_v21, 2 }
 0x19d   : > { %v3587_v49 = vsub.s32 %v1524_v24, %v1527_v55  ;;  %v2065_v33 = vor.u32 %v2064_v10, %v2063_v29  ;;  %v2068_v19 = vor.u32 %v2067_v9, %v2066_v35  ;;  %v2071_v11 = vor.u32 %v2070_v22, %v2069_v28 }
 0x19e   : > { %v1093_v37 = vadd.f32 -0.4999988, %v1092_v15  ;;  %v1100_v61 = vadd.f32 -0.16666654, %v1099_v51  ;;  %v2074_v53 = vor.u32 %v2073_v41, %v2072_v59  ;;  %vm2078_vm9 = vcmp.lt.s32.totalorder %v3589_v6, 1 }
 0x19f   : > { %vm1529_vm7 = vcmp.lt.s32.totalorder %v3587_v49, 0  ;;  %v1530_v13 = vsub.s32 0, %v3587_v49  ;;  %vm2081_vm10 = vcmp.lt.s32.totalorder %v3589_v6, 4  ;;  %v2096_v2 = vshrl.u32 %v3578_v30, 16 }
 0x1a0   : > { %v1094_v7 = vmul.f32 %v1093_v37, %v1089_v56  ;;  %v1101_v14 = vmul.f32 %v1100_v61, %v1089_v56  ;;  %v2494_v31 = vadd.s32 4294967169, %v655_v39  ;;  %vm1428_vm11 = vcmp.lt.s32.totalorder %v3348_v23, 0 }
 0x1a1   : > { %v1531_v58 = vsel %vm1529_vm7, %v1530_v13, %v3587_v49  ;;  %v2077_v18 = vor.u32 %v2076_v60, %v2075_v27  ;;  %vm2080_vm12 = vcmp.lt.s32.totalorder %v3589_v6, 3  ;;  %v2062_v0 = vshrl.u32 %v2676_v46, %v2061_v45 }
 0x1a2   : > { %v1095_v44 = vadd.f32 1.0, %v1094_v7  ;;  %v1102_v38 = vadd.f32 1.0, %v1101_v14  ;;  %v1532_v43 = vclz %v1531_v58  ;;  %vm2079_vm13 = vcmp.lt.s32.totalorder %v3589_v6, 2 }
 0x1a3   : > { %v2086_v34 = vsel %vm2078_vm9, %v2065_v33, %v2068_v19  ;;  %v1550_v57 = vsub.s32 4, %v3572_v3  ;;  %v2087_v32 = vsel %vm2081_vm10, %v2074_v53, 920167782  ;;  %v2090_v1 = vsel %vm2078_vm9, %v2068_v19, %v2071_v11 }
 0x1a4   : > { %v1103_v56 = vmul.f32 %v1102_v38, %v1087_v42  ;;  %v1112_v24 = vxor.u32 2147483648, %v1095_v44  ;;  %v2510_v4 = vadd.s32 4294967294, %v1532_v43  ;;  %v2083_v42 = vsel %vm2081_vm10, %v2071_v11, 2102212464 }
 0x1a5   : > { %v2088_v45 = vsel %vm2080_vm12, %v2071_v11, %v2087_v32  ;;  %v2091_v15 = vsel %vm2081_vm10, %v2077_v18, 1326507024  ;;  %v661_v14 = vadd.s32 1, %v2494_v31  ;;  %v3644_v11 = vsel %vm1428_vm11, %v1550_v57, %v3572_v3 }
 0x1a6   : > { %v1109_v40 = vxor.u32 2147483648, %v1103_v56  ;;  %v1113_v20 = vsel %vm1111_vm4, %v1112_v24, %v1103_v56  ;;  %vm2511_vm14 = vcmp.lt.s32.totalorder %v2510_v4, 0  ;;  %v2089_v28 = vsel %vm2079_vm13, %v2086_v34, %v2088_v45 }
 0x1a7   : > { %v1535_v35 = vsel %vm2511_vm14, 0, %v2510_v4  ;;  %v2092_v22 = vsel %vm2080_vm12, %v2074_v53, %v2091_v15  ;;  %v2119_v41 = vand.u32 65535, %v2089_v28  ;;  %v2120_v37 = vshrl.u32 %v2089_v28, 16 }
 0x1a8   : > { %v1110_v29 = vsel %vm1108_vm5, %v1095_v44, %v1109_v40  ;;  %v1536_v55 = vsub.s32 32, %v1535_v35  ;;  %v1537_v59 = vshll.u32 %v3587_v49, %v1535_v35  ;;  %v1540_v10 = vsub.s32 4294967266, %v1535_v35 }
 0x1a9   : > { %v1114_v51 = vsel %vm1107_vm6, %v1110_v29, %v1113_v20  ;;  %v2093_v21 = vsel %vm2079_vm13, %v2090_v1, %v2092_v22  ;;  %v2122_v49 = vmul.u32 %v2120_v37, %v3595_v36  ;;  %v2123_v53 = vmul.u32 %v2119_v41, %v2096_v2 }
 0x1aa   : > { %v1115_v9 = vsel %vm1104_vm8, nan, %v1114_v51  ;;  %v1538_v27 = vshrl.u32 %v3569_v47, %v1536_v55  ;;  %v1541_v60 = vadd.s32 127, %v1540_v10  ;;  %v2097_v39 = vand.u32 65535, %v2093_v21 }
 0x1ab   : > { %v2363_v61 = vmul.f32 %v3527_v8, %v1115_v9  ;;  %v2098_v7 = vshrl.u32 %v2093_v21, 16  ;;  %v2082_v47 = vsel %vm2078_vm9, %v2062_v0, %v2065_v33  ;;  %v2084_v44 = vsel %vm2080_vm12, %v2068_v19, %v2083_v42 }
 0x1ac   : > { %v1539_v26 = vor.u32 %v1538_v27, %v1537_v59  ;;  %v1542_v13 = vshll.u32 %v1541_v60, 23  ;;  %v2101_v58 = vmul.u32 %v2097_v39, %v2096_v2  ;;  %vm3653_vm15 = vcmp.le.f32.partialorder %v1426_v62, 0.7853982 }
 0x1ad   : > { %2376 = vst [vmem:[%s3119_s30 + $0x20] sm:$0xff] %v2363_v61  ;;  %v2100_v38 = vmul.u32 %v2098_v7, %v3595_v36  ;;  %v2121_v3 = vmul.u32 %v2119_v41, %v3595_v36  ;;  %v2124_v56 = vmul.u32 %v2120_v37, %v2096_v2  ;;  %v2125_v24 = vshll.u32 %v2122_v49, 16 }
 0x1ae   : > { %v1543_v31 = vor.u32 4788187, %v1542_v13  ;;  %v1546_v18 = vcvt.s32.f32 %v1539_v26  ;;  %v2099_v33 = vmul.u32 %v2097_v39, %v3595_v36  ;;  %v2102_v4 = vmul.u32 %v2098_v7, %v2096_v2 }
 0x1af   : > { %v2103_v0 = vshll.u32 %v2100_v38, 16  ;;  %v2105_v34 = vshll.u32 %v2101_v58, 16  ;;  %v2127_v40 = vshll.u32 %v2123_v53, 16  ;;  %vm2129_vm0 = vc.u32 %v2121_v3, %v2125_v24 }
 0x1b0   : > { %v1544_v19 = vand.u32 2147483647, %v1543_v31  ;;  %v2130_v62 = vsel %vm2129_vm0, 1, %v2682_v5  ;;  %v2131_v42 = vadd.s32 %v2125_v24, %v2121_v3  ;;  %v2085_v20 = vsel %vm2079_vm13, %v2082_v47, %v2084_v44 }
 0x1b1   : > { %vm2107_vm1 = vc.u32 %v2099_v33, %v2103_v0  ;;  %v2109_v57 = vadd.s32 %v2103_v0, %v2099_v33  ;;  %v2132_v1 = vadd.s32 %v2130_v62, %v2124_v56  ;;  %v2126_v36 = vshrl.u32 %v2122_v49, 16 }
 0x1b2   : > { %v1547_v32 = vmul.f32 %v1546_v18, %v1544_v19  ;;  %v2108_v45 = vsel %vm2107_vm1, 1, %v2682_v5  ;;  %vm2133_vm3 = vc.u32 %v2131_v42, %v2127_v40  ;;  %vm662_vm4 = vcmp.gt.s32.totalorder %v661_v14, 0 }
 0x1b3   : > { %v2110_v29 = vadd.s32 %v2108_v45, %v2102_v4  ;;  %vm2111_vm2 = vc.u32 %v2109_v57, %v2105_v34  ;;  %v2134_v28 = vsel %vm2133_vm3, 1, %v2682_v5  ;;  %v2104_v15 = vshrl.u32 %v2100_v38, 16 }
 0x1b4   : > { %v1548_v2 = vxor.u32 2147483648, %v1547_v32  ;;  %v2112_v35 = vsel %vm2111_vm2, 1, %v2682_v5  ;;  %v2136_v55 = vadd.s32 %v2134_v28, %v2132_v1  ;;  %v663_v59 = vsel %vm662_vm4, %v661_v14, 0 }
 0x1b5   : > { %v2114_v51 = vadd.s32 %v2112_v35, %v2110_v29  ;;  %v2106_v10 = vshrl.u32 %v2101_v58, 16  ;;  %v658_v9 = vand.u32 8388607, %v651_v16  ;;  %v665_v22 = vand.u32 31, %v663_v59 }
 0x1b6   : > { %v1549_v6 = vsel %vm1428_vm11, %v1548_v2, %v1547_v32  ;;  %v2128_v61 = vshrl.u32 %v2123_v53, 16  ;;  %v2137_v27 = vadd.s32 %v2136_v55, %v2126_v36  ;;  %v1553_v60 = vsel %vm3653_vm15, 0, %v3644_v11 }
 0x1b7   : > { %v1552_v41 = vsel %vm3653_vm15, %v3348_v23, %v1549_v6  ;;  %v2115_v37 = vadd.s32 %v2114_v51, %v2104_v15  ;;  %v2139_v39 = vmul.u32 %v3578_v30, %v2085_v20  ;;  %v3676_v7 = vsub.s32 32, %v665_v22 }
 0x1b8   : > { %v1554_v21 = vmul.f32 %v1552_v41, %v1552_v41  ;;  %v3680_v14 = vadd.s32 %v2131_v42, %v2127_v40  ;;  %v2138_v26 = vadd.s32 %v2137_v27, %v2128_v61  ;;  %v3682_v13 = vshrl.u32 %v663_v59, 5 }
 0x1b9   : > { %v3678_v49 = vadd.s32 %v2115_v37, %v2106_v10  ;;  %v668_v53 = vshll.u32 %v2676_v46, %v665_v22  ;;  %v671_v38 = vshll.u32 %v2677_v48, %v665_v22  ;;  %v672_v30 = vshrl.u32 %v2678_v50, %v3676_v7 }
 0x1ba   : > { %v1555_v47 = vmul.f32 -0.001358992, %v1554_v21  ;;  %v1562_v44 = vmul.f32 -0.00019511016, %v1554_v21  ;;  %v2142_v11 = vadd.s32 1, %v2138_v26  ;;  %v677_v58 = vshll.u32 %v2679_v52, %v665_v22 }
 0x1bb   : > { %vm2141_vm5 = vc.u32 %v3678_v49, %v3680_v14  ;;  %v674_v3 = vshll.u32 %v2678_v50, %v665_v22  ;;  %v675_v56 = vshrl.u32 %v2679_v52, %v3676_v7  ;;  %v669_v18 = vshrl.u32 %v2677_v48, %v3676_v7 }
 0x1bc   : > { %v1556_v43 = vadd.f32 0.041655596, %v1555_v47  ;;  %v1563_v31 = vadd.f32 0.008332121, %v1562_v44  ;;  %v2143_v24 = vsel %vm2141_vm5, %v2142_v11, %v2138_v26  ;;  %v678_v33 = vshrl.u32 %v2680_v54, %v3676_v7 }
 0x1bd   : > { %v680_v4 = vshll.u32 %v2680_v54, %v665_v22  ;;  %v2144_v34 = vadd.s32 %v2143_v24, %v2139_v39  ;;  %v659_v40 = vor.u32 8388608, %v658_v9  ;;  %v1570_v57 = vadd.s32 3, %v1553_v60 }
 0x1be   : > { %v1557_v0 = vmul.f32 %v1556_v43, %v1554_v21  ;;  %v1564_v19 = vmul.f32 %v1563_v31, %v1554_v21  ;;  %v3699_v62 = vor.u32 %v672_v30, %v671_v38  ;;  %v679_v42 = vor.u32 %v678_v33, %v677_v58 }
 0x1bf   : > { %v681_v32 = vshrl.u32 %v2681_v63, %v3676_v7  ;;  %v2145_v1 = vadd.s32 536870912, %v2144_v34  ;;  %v676_v29 = vor.u32 %v675_v56, %v674_v3  ;;  %v3703_v36 = vor.u32 %v669_v18, %v668_v53 }
 0x1c0   : > { %v1558_v20 = vadd.f32 -0.4999988, %v1557_v0  ;;  %v1565_v45 = vadd.f32 -0.16666654, %v1564_v19  ;;  %vm683_vm6 = vcmp.lt.s32.totalorder %v3682_v13, 1  ;;  %vm686_vm7 = vcmp.lt.s32.totalorder %v3682_v13, 4 }
 0x1c1   : > { %v682_v2 = vor.u32 %v681_v32, %v680_v4  ;;  %v3707_v15 = vshrl.u32 %v2145_v1, 30  ;;  %vm685_vm8 = vcmp.lt.s32.totalorder %v3682_v13, 3  ;;  %vm684_vm9 = vcmp.lt.s32.totalorder %v3682_v13, 2 }
 0x1c2   : > { %v1559_v35 = vmul.f32 %v1558_v20, %v1554_v21  ;;  %v1566_v28 = vmul.f32 %v1565_v45, %v1554_v21  ;;  %v692_v51 = vsel %vm686_vm7, %v679_v42, 920167782  ;;  %v3715_v59 = vshll.u32 %v659_v40, 8 }
 0x1c3   : > { %v696_v55 = vsel %vm686_vm7, %v682_v2, 1326507024  ;;  %v2147_v9 = vshll.u32 %v3707_v15, 30  ;;  %v695_v22 = vsel %vm683_vm6, %v3699_v62, %v676_v29  ;;  %v1571_v37 = vand.u32 3, %v1570_v57  ;;  %v316_v2 = vpop.f32.mrf.mxu1 }
 0x1c4   : > { %v1560_v6 = vadd.f32 1.0, %v1559_v35  ;;  %v1567_v10 = vadd.f32 1.0, %v1566_v28  ;;  %v691_v61 = vsel %vm683_vm6, %v3703_v36, %v3699_v62  ;;  %v693_v27 = vsel %vm685_vm8, %v676_v29, %v692_v51 }
 0x1c5   : > { %v697_v60 = vsel %vm685_vm8, %v679_v42, %v696_v55  ;;  %v2148_v26 = vsub.s32 %v2144_v34, %v2147_v9  ;;  %vm1569_vm10 = vweird.f32 %v3348_v23  ;;  %v700_v44 = vand.u32 65535, %v3715_v59 }
 0x1c6   : > { %v1568_v21 = vmul.f32 %v1567_v10, %v1552_v41  ;;  %v1577_v39 = vxor.u32 2147483648, %v1560_v6  ;;  %v698_v47 = vsel %vm684_vm9, %v695_v22, %v697_v60  ;;  %v701_v53 = vshrl.u32 %v3715_v59, 16 }
 0x1c7   : > { %vm2149_vm11 = vcmp.lt.s32.totalorder %v2148_v26, 0  ;;  %v2150_v11 = vsub.s32 0, %v2148_v26  ;;  %v694_v30 = vsel %vm684_vm9, %v691_v61, %v693_v27  ;;  %vm1573_vm12 = vcmp.eq.s32.totalorder %v1571_v37, 0 }
 0x1c8   : > { %v1574_v38 = vxor.u32 2147483648, %v1568_v21  ;;  %vm1576_vm13 = vcmp.eq.s32.totalorder %v1571_v37, 2  ;;  %v702_v41 = vand.u32 65535, %v698_v47  ;;  %v703_v58 = vshrl.u32 %v698_v47, 16 }
 0x1c9   : > { %vm1572_vm14 = vcmp.lt.s32.totalorder %v1571_v37, 2  ;;  %v1578_v31 = vsel %vm1576_vm13, %v1577_v39, %v1568_v21  ;;  %v2151_v3 = vsel %vm2149_vm11, %v2150_v11, %v2148_v26  ;;  %v724_v18 = vand.u32 65535, %v694_v30 }
 0x1ca   : > { %v1575_v43 = vsel %vm1573_vm12, %v1560_v6, %v1574_v38  ;;  %v2152_v24 = vclz %v2151_v3  ;;  %v725_v33 = vshrl.u32 %v694_v30, 16  ;;  %v704_v0 = vmul.u32 %v702_v41, %v700_v44 }
 0x1cb   : > { %v1579_v56 = vsel %vm1572_vm14, %v1575_v43, %v1578_v31  ;;  %v705_v19 = vmul.u32 %v703_v58, %v700_v44  ;;  %v706_v34 = vmul.u32 %v702_v41, %v701_v53  ;;  %v667_v42 = vshrl.u32 %v2676_v46, %v3676_v7 }
 0x1cc   : > { %v1580_v4 = vsel %vm1569_vm10, nan, %v1579_v56  ;;  %v2522_v57 = vadd.s32 4294967294, %v2152_v24  ;;  %v2140_v32 = vadd.s32 %v3680_v14, %v3678_v49  ;;  %v688_v20 = vsel %vm686_vm7, %v676_v29, 2102212464  ;;  %v3750_v49 = vld [vmem:[%s4299_s2] ss:$0 sm:$0xff] }
 0x1cd   : > { %v2366_v40 = vmul.f32 %v3527_v8, %v1580_v4  ;;  %v708_v45 = vshll.u32 %v705_v19, 16  ;;  %v710_v1 = vshll.u32 %v706_v34, 16  ;;  %v707_v23 = vmul.u32 %v703_v58, %v701_v53 }
 0x1ce   : > { %vm2523_vm15 = vcmp.lt.s32.totalorder %v2522_v57, 0  ;;  %v726_v35 = vmul.u32 %v724_v18, %v700_v44  ;;  %v727_v28 = vmul.u32 %v725_v33, %v700_v44  ;;  %v728_v6 = vmul.u32 %v724_v18, %v701_v53 }
 0x1cf   : > { %2379 = vst [vmem:[%s3119_s30 + $0x38] sm:$0xff] %v2366_v40  ;;  %v2155_v51 = vsel %vm2523_vm15, 0, %v2522_v57  ;;  %vm712_vm0 = vc.u32 %v704_v0, %v708_v45  ;;  %v714_v55 = vadd.s32 %v708_v45, %v704_v0  ;;  %v3753_v14 = vadd.f32 %v3750_v49, %v316_v2 }
 0x1d0   : > { %v2156_v10 = vsub.s32 32, %v2155_v51  ;;  %v2160_v7 = vsub.s32 4294967266, %v2155_v51  ;;  %v713_v9 = vsel %vm712_vm0, 1, %v2682_v5  ;;  %v709_v29 = vshrl.u32 %v705_v19, 16 }
 0x1d1   : > { %v715_v22 = vadd.s32 %v713_v9, %v707_v23  ;;  %vm716_vm1 = vc.u32 %v714_v55, %v710_v1  ;;  %v730_v37 = vshll.u32 %v727_v28, 16  ;;  %v2157_v61 = vshll.u32 %v2148_v26, %v2155_v51 }
 0x1d2   : > { %v2158_v27 = vshrl.u32 %v2140_v32, %v2156_v10  ;;  %v2161_v60 = vadd.s32 127, %v2160_v7  ;;  %v717_v21 = vsel %vm716_vm1, 1, %v2682_v5  ;;  %v729_v47 = vmul.u32 %v725_v33, %v701_v53 }
 0x1d3   : > { %v719_v39 = vadd.s32 %v717_v21, %v715_v22  ;;  %v732_v44 = vshll.u32 %v728_v6, 16  ;;  %vm734_vm2 = vc.u32 %v726_v35, %v730_v37  ;;  %v736_v41 = vadd.s32 %v730_v37, %v726_v35 }
 0x1d4   : > { %v2159_v38 = vor.u32 %v2158_v27, %v2157_v61  ;;  %v2162_v11 = vshll.u32 %v2161_v60, 23  ;;  %v735_v30 = vsel %vm734_vm2, 1, %v2682_v5  ;;  %v2170_v58 = vsub.s32 4, %v3707_v15 }
 0x1d5   : > { %v720_v43 = vadd.s32 %v719_v39, %v709_v29  ;;  %v737_v31 = vadd.s32 %v735_v30, %v729_v47  ;;  %vm2048_vm3 = vcmp.lt.s32.totalorder %v3522_v17, 0  ;;  %v687_v3 = vsel %vm683_vm6, %v667_v42, %v3703_v36 }
 0x1d6   : > { %v2163_v26 = vor.u32 4788187, %v2162_v11  ;;  %vm738_vm4 = vc.u32 %v736_v41, %v732_v44  ;;  %v689_v53 = vsel %vm685_vm8, %v3699_v62, %v688_v20  ;;  %v711_v56 = vshrl.u32 %v706_v34, 16  ;;  %v325_v34 = vpop.f32.mrf.mxu2 }
 0x1d7   : > { %v739_v24 = vsel %vm738_vm4, 1, %v2682_v5  ;;  %v1119_v18 = vand.u32 2139095040, %v3753_v14  ;;  %v2166_v4 = vcvt.s32.f32 %v2159_v38  ;;  %v731_v0 = vshrl.u32 %v727_v28, 16 }
 0x1d8   : > { %v2164_v33 = vand.u32 2147483647, %v2163_v26  ;;  %v741_v19 = vadd.s32 %v739_v24, %v737_v31  ;;  %v2171_v40 = vsel %vm2048_vm3, %v2170_v58, %v3707_v15  ;;  %v721_v57 = vadd.s32 %v720_v43, %v711_v56 }
 0x1d9   : > { %v1116_v36 = vand.u32 2147483647, %v3753_v14  ;;  %v1120_v42 = vshrl.u32 %v1119_v18, 23  ;;  %v733_v45 = vshrl.u32 %v728_v6, 16  ;;  %vm2047_vm5 = vcmp.le.f32.partialorder %v2046_v12, 0.7853982 }
 0x1da   : > { %v2167_v32 = vmul.f32 %v2166_v4, %v2164_v33  ;;  %v742_v62 = vadd.s32 %v741_v19, %v731_v0  ;;  %v740_v20 = vadd.s32 %v736_v41, %v732_v44  ;;  %v2173_v23 = vsel %vm2047_vm5, 0, %v2171_v40 }
 0x1db   : > { %v2503_v1 = vadd.s32 4294967169, %v1120_v42  ;;  %v690_v35 = vsel %vm684_vm9, %v687_v3, %v689_v53  ;;  %v1123_v15 = vand.u32 8388607, %v1116_v36  ;;  %v3778_v55 = vadd.f32 %v3750_v49, %v325_v34 }
 0x1dc   : > { %v2168_v2 = vxor.u32 2147483648, %v2167_v32  ;;  %v743_v28 = vadd.s32 %v742_v62, %v733_v45  ;;  %vm746_vm6 = vc.u32 %v721_v57, %v740_v20  ;;  %v2190_v7 = vadd.s32 3, %v2173_v23 }
 0x1dd   : > { %v1126_v51 = vadd.s32 1, %v2503_v1  ;;  %v744_v9 = vmul.u32 %v3715_v59, %v690_v35  ;;  %v1124_v61 = vor.u32 8388608, %v1123_v15  ;;  %v1584_v60 = vand.u32 2139095040, %v3778_v55 }
 0x1de   : > { %v2169_v6 = vsel %vm2048_vm3, %v2168_v2, %v2167_v32  ;;  %v747_v12 = vadd.s32 1, %v743_v28  ;;  %v3785_v47 = vand.u32 3, %v2190_v7  ;;  %v3787_v41 = vadd.s32 %v740_v20, %v721_v57 }
 0x1df   : > { %v2172_v10 = vsel %vm2047_vm5, %v3522_v17, %v2169_v6  ;;  %vm1127_vm7 = vcmp.gt.s32.totalorder %v1126_v51, 0  ;;  %v1581_v59 = vand.u32 2147483647, %v3778_v55  ;;  %v3794_v31 = vshll.u32 %v1124_v61, 8 }
 0x1e0   : > { %v2174_v13 = vmul.f32 %v2172_v10, %v2172_v10  ;;  %v748_v29 = vsel %vm746_vm6, %v747_v12, %v743_v28  ;;  %v1128_v22 = vsel %vm1127_vm7, %v1126_v51, 0  ;;  %v1585_v26 = vshrl.u32 %v1584_v60, 23 }
 0x1e1   : > { %v749_v37 = vadd.s32 %v748_v29, %v744_v9  ;;  %v1130_v27 = vand.u32 31, %v1128_v22  ;;  %v3792_v43 = vshrl.u32 %v1128_v22, 5  ;;  %vm2196_vm8 = vcmp.eq.s32.totalorder %v3785_v47, 2 }
 0x1e2   : > { %v2175_v21 = vmul.f32 -0.001358992, %v2174_v13  ;;  %v2182_v39 = vmul.f32 -0.00019511016, %v2174_v13  ;;  %vm2193_vm9 = vcmp.eq.s32.totalorder %v3785_v47, 0  ;;  %vm2192_vm10 = vcmp.lt.s32.totalorder %v3785_v47, 2 }
 0x1e3   : > { %v750_v44 = vadd.s32 536870912, %v749_v37  ;;  %v1131_v38 = vsub.s32 32, %v1130_v27  ;;  %v1133_v56 = vshll.u32 %v2676_v46, %v1130_v27  ;;  %v1136_v24 = vshll.u32 %v2677_v48, %v1130_v27 }
 0x1e4   : > { %v2176_v11 = vadd.f32 0.041655596, %v2175_v21  ;;  %v2183_v30 = vadd.f32 0.008332121, %v2182_v39  ;;  %v1139_v4 = vshll.u32 %v2678_v50, %v1130_v27  ;;  %v1142_v0 = vshll.u32 %v2679_v52, %v1130_v27 }
 0x1e5   : > { %v3790_v58 = vshrl.u32 %v750_v44, 30  ;;  %v1134_v33 = vshrl.u32 %v2677_v48, %v1131_v38  ;;  %v1137_v57 = vshrl.u32 %v2678_v50, %v1131_v38  ;;  %v1140_v42 = vshrl.u32 %v2679_v52, %v1131_v38 }
 0x1e6   : > { %v2177_v3 = vmul.f32 %v2176_v11, %v2174_v13  ;;  %v2184_v53 = vmul.f32 %v2183_v30, %v2174_v13  ;;  %v1143_v45 = vshrl.u32 %v2680_v54, %v1131_v38  ;;  %v1145_v62 = vshll.u32 %v2680_v54, %v1130_v27 }
 0x1e7   : > { %v752_v18 = vshll.u32 %v3790_v58, 30  ;;  %v1146_v34 = vshrl.u32 %v2681_v63, %v1131_v38  ;;  %v3813_v2 = vand.u32 65535, %v3794_v31  ;;  %v3816_v23 = vshrl.u32 %v3794_v31, 16 }
 0x1e8   : > { %v2178_v19 = vadd.f32 -0.4999988, %v2177_v3  ;;  %v2185_v40 = vadd.f32 -0.16666654, %v2184_v53  ;;  %vm2189_vm11 = vweird.f32 %v3522_v17  ;;  %v1132_v28 = vshrl.u32 %v2676_v46, %v1131_v38 }
 0x1e9   : > { %v3806_v32 = vsub.s32 %v749_v37, %v752_v18  ;;  %v1135_v15 = vor.u32 %v1134_v33, %v1133_v56  ;;  %v1138_v12 = vor.u32 %v1137_v57, %v1136_v24  ;;  %v1141_v7 = vor.u32 %v1140_v42, %v1139_v4 }
 0x1ea   : > { %v2179_v20 = vmul.f32 %v2178_v19, %v2174_v13  ;;  %v2186_v1 = vmul.f32 %v2185_v40, %v2174_v13  ;;  %v1144_v13 = vor.u32 %v1143_v45, %v1142_v0  ;;  %v1147_v29 = vor.u32 %v1146_v34, %v1145_v62 }
 0x1eb   : > { %vm754_vm12 = vcmp.lt.s32.totalorder %v3806_v32, 0  ;;  %v755_v35 = vsub.s32 0, %v3806_v32  ;;  %vm1148_vm13 = vcmp.lt.s32.totalorder %v3792_v43, 1  ;;  %vm1151_vm14 = vcmp.lt.s32.totalorder %v3792_v43, 4 }
 0x1ec   : > { %v2180_v51 = vadd.f32 1.0, %v2179_v20  ;;  %v2187_v6 = vadd.f32 1.0, %v2186_v1  ;;  %v775_v27 = vsub.s32 4, %v3790_v58  ;;  %vm1149_vm15 = vcmp.lt.s32.totalorder %v3792_v43, 2 }
 0x1ed   : > { %v756_v9 = vsel %vm754_vm12, %v755_v35, %v3806_v32  ;;  %vm1150_vm0 = vcmp.lt.s32.totalorder %v3792_v43, 3  ;;  %v2512_v60 = vadd.s32 4294967169, %v1585_v26  ;;  %vm653_vm1 = vcmp.lt.s32.totalorder %v3565_v25, 0 }
 0x1ee   : > { %v2188_v22 = vmul.f32 %v2187_v6, %v2172_v10  ;;  %v2197_v37 = vxor.u32 2147483648, %v2180_v51  ;;  %v757_v61 = vclz %v756_v9  ;;  %v1152_v10 = vsel %vm1148_vm13, %v1132_v28, %v1135_v15 }
 0x1ef   : > { %v1156_v38 = vsel %vm1148_vm13, %v1135_v15, %v1138_v12  ;;  %v1157_v11 = vsel %vm1151_vm14, %v1144_v13, 920167782  ;;  %v1160_v30 = vsel %vm1148_vm13, %v1138_v12, %v1141_v7  ;;  %v1161_v26 = vsel %vm1151_vm14, %v1147_v29, 1326507024 }
 0x1f0   : > { %v2194_v21 = vxor.u32 2147483648, %v2188_v22  ;;  %v2198_v39 = vsel %vm2196_vm8, %v2197_v37, %v2188_v22  ;;  %v2495_v44 = vadd.s32 4294967294, %v757_v61  ;;  %v1158_v53 = vsel %vm1150_vm0, %v1141_v7, %v1157_v11 }
 0x1f1   : > { %v1162_v56 = vsel %vm1150_vm0, %v1144_v13, %v1161_v26  ;;  %v1159_v33 = vsel %vm1149_vm15, %v1156_v38, %v1158_v53  ;;  %v1153_v57 = vsel %vm1151_vm14, %v1141_v7, 2102212464  ;;  %v1591_v9 = vadd.s32 1, %v2512_v60 }
 0x1f2   : > { %v2195_v3 = vsel %vm2193_vm9, %v2180_v51, %v2194_v21  ;;  %vm2496_vm2 = vcmp.lt.s32.totalorder %v2495_v44, 0  ;;  %v1163_v4 = vsel %vm1149_vm15, %v1160_v30, %v1162_v56  ;;  %v1189_v62 = vand.u32 65535, %v1159_v33 }
 0x1f3   : > { %v2199_v24 = vsel %vm2192_vm10, %v2195_v3, %v2198_v39  ;;  %v760_v18 = vsel %vm2496_vm2, 0, %v2495_v44  ;;  %v1167_v47 = vand.u32 65535, %v1163_v4  ;;  %v1168_v45 = vshrl.u32 %v1163_v4, 16 }
 0x1f4   : > { %v2200_v0 = vsel %vm2189_vm11, nan, %v2199_v24  ;;  %v761_v19 = vsub.s32 32, %v760_v18  ;;  %v765_v40 = vsub.s32 4294967266, %v760_v18  ;;  %v762_v34 = vshll.u32 %v3806_v32, %v760_v18 }
 0x1f5   : > { %v2370_v42 = vmul.f32 %v3527_v8, %v2200_v0  ;;  %v1190_v35 = vshrl.u32 %v1159_v33, 16  ;;  %v1154_v17 = vsel %vm1150_vm0, %v1138_v12, %v1153_v57  ;;  %v1169_v28 = vmul.u32 %v1167_v47, %v3813_v2 }
 0x1f6   : > { %v763_v20 = vshrl.u32 %v3787_v41, %v761_v19  ;;  %v766_v1 = vadd.s32 127, %v765_v40  ;;  %v1170_v15 = vmul.u32 %v1168_v45, %v3813_v2  ;;  %v1171_v51 = vmul.u32 %v1167_v47, %v3816_v23 }
 0x1f7   : > { %2383 = vst [vmem:[%s3119_s30 + $0x58] sm:$0xff] %v2370_v42  ;;  %v1192_v7 = vmul.u32 %v1190_v35, %v3813_v2  ;;  %v3870_v41 = vsel %vm653_vm1, %v775_v27, %v3790_v58  ;;  %v1191_v12 = vmul.u32 %v1189_v62, %v3813_v2  ;;  %vm3875_vm3 = vcmp.le.f32.partialorder %v651_v16, 0.7853982 }
 0x1f8   : > { %v764_v8 = vor.u32 %v763_v20, %v762_v34  ;;  %v767_v6 = vshll.u32 %v766_v1, 23  ;;  %v1173_v32 = vshll.u32 %v1170_v15, 16  ;;  %v1175_v13 = vshll.u32 %v1171_v51, 16 }
 0x1f9   : > { %v3881_v37 = vsel %vm1149_vm15, %v1152_v10, %v1154_v17  ;;  %v1172_v61 = vmul.u32 %v1168_v45, %v3816_v23  ;;  %v1193_v58 = vmul.u32 %v1189_v62, %v3816_v23  ;;  %v1195_v21 = vshll.u32 %v1192_v7, 16 }
 0x1fa   : > { %v768_v22 = vor.u32 4788187, %v767_v6  ;;  %v771_v27 = vcvt.s32.f32 %v764_v8  ;;  %vm1177_vm4 = vc.u32 %v1169_v28, %v1173_v32  ;;  %v1179_v60 = vadd.s32 %v1173_v32, %v1169_v28 }
 0x1fb   : > { %v1178_v39 = vsel %vm1177_vm4, 1, %v2682_v5  ;;  %v1194_v16 = vmul.u32 %v1190_v35, %v3816_v23  ;;  %v1197_v44 = vshll.u32 %v1193_v58, 16  ;;  %vm1199_vm6 = vc.u32 %v1191_v12, %v1195_v21 }
 0x1fc   : > { %v769_v2 = vand.u32 2147483647, %v768_v22  ;;  %v1180_v38 = vadd.s32 %v1178_v39, %v1172_v61  ;;  %vm1181_vm5 = vc.u32 %v1179_v60, %v1175_v13  ;;  %v1201_v43 = vadd.s32 %v1195_v21, %v1191_v12 }
 0x1fd   : > { %v1182_v11 = vsel %vm1181_vm5, 1, %v2682_v5  ;;  %v1200_v30 = vsel %vm1199_vm6, 1, %v2682_v5  ;;  %vm1592_vm7 = vcmp.gt.s32.totalorder %v1591_v9, 0  ;;  %v1174_v26 = vshrl.u32 %v1170_v15, 16 }
 0x1fe   : > { %v772_v10 = vmul.f32 %v771_v27, %v769_v2  ;;  %v1184_v3 = vadd.s32 %v1182_v11, %v1180_v38  ;;  %v1202_v53 = vadd.s32 %v1200_v30, %v1194_v16  ;;  %vm1203_vm8 = vc.u32 %v1201_v43, %v1197_v44 }
 0x1ff   : > { %v1176_v24 = vshrl.u32 %v1171_v51, 16  ;;  %v1204_v18 = vsel %vm1203_vm8, 1, %v2682_v5  ;;  %v1593_v23 = vsel %vm1592_vm7, %v1591_v9, 0  ;;  %v1196_v4 = vshrl.u32 %v1192_v7, 16 }
 0x200   : > { %v773_v56 = vxor.u32 2147483648, %v772_v10  ;;  %v1185_v33 = vadd.s32 %v1184_v3, %v1174_v26  ;;  %v1206_v0 = vadd.s32 %v1204_v18, %v1202_v53  ;;  %v1595_v19 = vand.u32 31, %v1593_v23 }
 0x201   : > { %v1198_v57 = vshrl.u32 %v1193_v58, 16  ;;  %v3892_v42 = vadd.s32 %v1201_v43, %v1197_v44  ;;  %v1588_v47 = vand.u32 8388607, %v1581_v59  ;;  %v778_v1 = vsel %vm3875_vm3, 0, %v3870_v41 }
 0x202   : > { %v774_v40 = vsel %vm653_vm1, %v773_v56, %v772_v10  ;;  %v3899_v62 = vadd.s32 %v1185_v33, %v1176_v24  ;;  %v1207_v34 = vadd.s32 %v1206_v0, %v1196_v4  ;;  %v3901_v20 = vsub.s32 32, %v1595_v19 }
 0x203   : > { %v777_v45 = vsel %vm3875_vm3, %v3565_v25, %v774_v40  ;;  %v1209_v17 = vmul.u32 %v3794_v31, %v3881_v37  ;;  %v3908_v28 = vshrl.u32 %v1593_v23, 5  ;;  %v1598_v51 = vshll.u32 %v2676_v46, %v1595_v19 }
 0x204   : > { %v779_v35 = vmul.f32 %v777_v45, %v777_v45  ;;  %v1208_v15 = vadd.s32 %v1207_v34, %v1198_v57  ;;  %vm1211_vm9 = vc.u32 %v3899_v62, %v3892_v42  ;;  %v1601_v8 = vshll.u32 %v2677_v48, %v1595_v19 }
 0x205   : > { %v1599_v9 = vshrl.u32 %v2677_v48, %v3901_v20  ;;  %v1602_v41 = vshrl.u32 %v2678_v50, %v3901_v20  ;;  %v1605_v31 = vshrl.u32 %v2679_v52, %v3901_v20  ;;  %v1607_v13 = vshll.u32 %v2679_v52, %v1595_v19 }
 0x206   : > { %v780_v6 = vmul.f32 -0.001358992, %v779_v35  ;;  %v787_v7 = vmul.f32 -0.00019511016, %v779_v35  ;;  %v1212_v32 = vadd.s32 1, %v1208_v15  ;;  %v1608_v12 = vshrl.u32 %v2680_v54, %v3901_v20 }
 0x207   : > { %v3923_v37 = vor.u32 %v1599_v9, %v1598_v51  ;;  %v1604_v61 = vshll.u32 %v2678_v50, %v1595_v19  ;;  %v3926_v27 = vor.u32 %v1602_v41, %v1601_v8  ;;  %v1610_v21 = vshll.u32 %v2680_v54, %v1595_v19 }
 0x208   : > { %v781_v29 = vadd.f32 0.041655596, %v780_v6  ;;  %v788_v22 = vadd.f32 0.008332121, %v787_v7  ;;  %v1213_v58 = vsel %vm1211_vm9, %v1212_v32, %v1208_v15  ;;  %v1609_v60 = vor.u32 %v1608_v12, %v1607_v13 }
 0x209   : > { %v1214_v16 = vadd.s32 %v1213_v58, %v1209_v17  ;;  %v1611_v44 = vshrl.u32 %v2681_v63, %v3901_v20  ;;  %v795_v38 = vadd.s32 3, %v778_v1  ;;  %v3931_v43 = vor.u32 %v1605_v31, %v1604_v61 }
 0x20a   : > { %v782_v2 = vmul.f32 %v781_v29, %v779_v35  ;;  %v789_v39 = vmul.f32 %v788_v22, %v779_v35  ;;  %vm1616_vm10 = vcmp.lt.s32.totalorder %v3908_v28, 4  ;;  %v1589_v3 = vor.u32 8388608, %v1588_v47 }
 0x20b   : > { %v1215_v30 = vadd.s32 536870912, %v1214_v16  ;;  %v1612_v26 = vor.u32 %v1611_v44, %v1610_v21  ;;  %vm1613_vm11 = vcmp.lt.s32.totalorder %v3908_v28, 1  ;;  %vm1615_vm12 = vcmp.lt.s32.totalorder %v3908_v28, 3  ;;  %v337_v21 = vpop.f32.mrf.mxu3  ;;  %v3972_v44 = vld [vmem:[%s4300_s3] ss:$0 sm:$0xff] }
 0x20c   : > { %v783_v10 = vadd.f32 -0.4999988, %v782_v2  ;;  %v790_v11 = vadd.f32 -0.16666654, %v789_v39  ;;  %v1622_v53 = vsel %vm1616_vm10, %v1609_v60, 920167782  ;;  %v1621_v23 = vsel %vm1613_vm11, %v3923_v37, %v3926_v27 }
 0x20d   : > { %v3938_v18 = vshrl.u32 %v1215_v30, 30  ;;  %v796_v33 = vand.u32 3, %v795_v38  ;;  %vm1614_vm13 = vcmp.lt.s32.totalorder %v3908_v28, 2  ;;  %v1623_v4 = vsel %vm1615_vm12, %v3931_v43, %v1622_v53 }
 0x20e   : > { %v784_v56 = vmul.f32 %v783_v10, %v779_v35  ;;  %v791_v24 = vmul.f32 %v790_v11, %v779_v35  ;;  %v1626_v0 = vsel %vm1616_vm10, %v1612_v26, 1326507024  ;;  %v1625_v47 = vsel %vm1613_vm11, %v3926_v27, %v3931_v43 }
 0x20f   : > { %v1217_v57 = vshll.u32 %v3938_v18, 30  ;;  %v1624_v34 = vsel %vm1614_vm13, %v1621_v23, %v1623_v4  ;;  %v1627_v1 = vsel %vm1615_vm12, %v1609_v60, %v1626_v0  ;;  %v3959_v35 = vshll.u32 %v1589_v3, 8 }
 0x210   : > { %v785_v19 = vadd.f32 1.0, %v784_v56  ;;  %v792_v40 = vadd.f32 1.0, %v791_v24  ;;  %vm797_vm14 = vcmp.lt.s32.totalorder %v796_v33, 2  ;;  %vm798_vm15 = vcmp.eq.s32.totalorder %v796_v33, 0 }
 0x211   : > { %v1218_v51 = vsub.s32 %v1214_v16, %v1217_v57  ;;  %v1628_v8 = vsel %vm1614_vm13, %v1625_v47, %v1627_v1  ;;  %v1655_v6 = vshrl.u32 %v1624_v34, 16  ;;  %vm801_vm0 = vcmp.eq.s32.totalorder %v796_v33, 2 }
 0x212   : > { %v793_v17 = vmul.f32 %v792_v40, %v777_v45  ;;  %v802_v15 = vxor.u32 2147483648, %v785_v19  ;;  %v1630_v41 = vand.u32 65535, %v3959_v35  ;;  %v1631_v32 = vshrl.u32 %v3959_v35, 16 }
 0x213   : > { %vm1219_vm1 = vcmp.lt.s32.totalorder %v1218_v51, 0  ;;  %v1220_v9 = vsub.s32 0, %v1218_v51  ;;  %v1632_v31 = vand.u32 65535, %v1628_v8  ;;  %v1633_v13 = vshrl.u32 %v1628_v8, 16 }
 0x214   : > { %v799_v7 = vxor.u32 2147483648, %v793_v17  ;;  %v803_v45 = vsel %vm801_vm0, %v802_v15, %v793_v17  ;;  %v1654_v22 = vand.u32 65535, %v1624_v34  ;;  %vm794_vm2 = vweird.f32 %v3565_v25 }
 0x215   : > { %v1221_v29 = vsel %vm1219_vm1, %v1220_v9, %v1218_v51  ;;  %v3967_v60 = vmul.u32 %v1655_v6, %v1630_v41  ;;  %v1635_v39 = vmul.u32 %v1633_v13, %v1630_v41  ;;  %v1636_v16 = vmul.u32 %v1632_v31, %v1631_v32 }
 0x216   : > { %v800_v12 = vsel %vm798_vm15, %v785_v19, %v799_v7  ;;  %v1222_v58 = vclz %v1221_v29  ;;  %v1210_v25 = vadd.s32 %v3892_v42, %v3899_v62  ;;  %v1597_v11 = vshrl.u32 %v2676_v46, %v3901_v20 }
 0x217   : > { %v804_v61 = vsel %vm797_vm14, %v800_v12, %v803_v45  ;;  %v1634_v30 = vmul.u32 %v1632_v31, %v1630_v41  ;;  %v1638_v26 = vshll.u32 %v1635_v39, 16  ;;  %v1656_v3 = vmul.u32 %v1654_v22, %v1630_v41 }
 0x218   : > { %v805_v2 = vsel %vm794_vm2, nan, %v804_v61  ;;  %v2504_v10 = vadd.s32 4294967294, %v1222_v58  ;;  %v3980_v53 = vadd.f32 %v3750_v49, %v337_v21  ;;  %v1637_v56 = vmul.u32 %v1633_v13, %v1631_v32 }
 0x219   : > { %v2361_v38 = vmul.f32 %v3972_v44, %v805_v2  ;;  %v1658_v24 = vmul.u32 %v1654_v22, %v1631_v32  ;;  %v1660_v23 = vshll.u32 %v3967_v60, 16  ;;  %v1640_v4 = vshll.u32 %v1636_v16, 16 }
 0x21a   : > { %vm2505_vm3 = vcmp.lt.s32.totalorder %v2504_v10, 0  ;;  %vm1642_vm4 = vc.u32 %v1634_v30, %v1638_v26  ;;  %v1644_v42 = vadd.s32 %v1638_v26, %v1634_v30  ;;  %vm1118_vm5 = vcmp.lt.s32.totalorder %v3753_v14, 0 }
 0x21b   : > { %2374 = vst [vmem:[%s3119_s30 + $0x10] sm:$0xff] %v2361_v38  ;;  %v1225_v33 = vsel %vm2505_vm3, 0, %v2504_v10  ;;  %v1639_v0 = vshrl.u32 %v1635_v39, 16  ;;  %v1643_v19 = vsel %vm1642_vm4, 1, %v2682_v5  ;;  %v1659_v47 = vmul.u32 %v1655_v6, %v1631_v32 }
 0x21c   : > { %v1226_v62 = vsub.s32 32, %v1225_v33  ;;  %v1230_v20 = vsub.s32 4294967266, %v1225_v33  ;;  %v1227_v40 = vshll.u32 %v1218_v51, %v1225_v33  ;;  %v1645_v57 = vadd.s32 %v1643_v19, %v1637_v56 }
 0x21d   : > { %vm1646_vm6 = vc.u32 %v1644_v42, %v1640_v4  ;;  %vm1664_vm7 = vc.u32 %v1656_v3, %v1660_v23  ;;  %v1662_v8 = vshll.u32 %v1658_v24, 16  ;;  %v1666_v9 = vadd.s32 %v1660_v23, %v1656_v3 }
 0x21e   : > { %v1228_v34 = vshrl.u32 %v1210_v25, %v1226_v62  ;;  %v1231_v1 = vadd.s32 127, %v1230_v20  ;;  %v1647_v17 = vsel %vm1646_vm6, 1, %v2682_v5  ;;  %v1665_v7 = vsel %vm1664_vm7, 1, %v2682_v5 }
 0x21f   : > { %v1649_v15 = vadd.s32 %v1647_v17, %v1645_v57  ;;  %v1618_v13 = vsel %vm1616_vm10, %v3931_v43, 2102212464  ;;  %v1667_v51 = vadd.s32 %v1665_v7, %v1659_v47  ;;  %v1240_v12 = vsub.s32 4, %v3938_v18 }
 0x220   : > { %v1229_v41 = vor.u32 %v1228_v34, %v1227_v40  ;;  %v1232_v31 = vshll.u32 %v1231_v1, 23  ;;  %vm1668_vm8 = vc.u32 %v1666_v9, %v1662_v8  ;;  %v2201_v32 = vand.u32 2147483647, %v3980_v53 }
 0x221   : > { %v1650_v6 = vadd.s32 %v1649_v15, %v1639_v0  ;;  %v1641_v29 = vshrl.u32 %v1636_v16, 16  ;;  %v1669_v22 = vsel %vm1668_vm8, 1, %v2682_v5  ;;  %v2204_v61 = vand.u32 2139095040, %v3980_v53 }
 0x222   : > { %v1233_v45 = vor.u32 4788187, %v1232_v31  ;;  %v1617_v58 = vsel %vm1613_vm11, %v1597_v11, %v3923_v37  ;;  %v1619_v43 = vsel %vm1615_vm12, %v3926_v27, %v1618_v13  ;;  %v1661_v21 = vshrl.u32 %v3967_v60, 16  ;;  %v328_v27 = vpop.f32.mrf.mxu2 }
 0x223   : > { %v1671_v2 = vadd.s32 %v1669_v22, %v1667_v51  ;;  %v1236_v38 = vcvt.s32.f32 %v1229_v41  ;;  %v1651_v25 = vadd.s32 %v1650_v6, %v1641_v29  ;;  %v2205_v10 = vshrl.u32 %v2204_v61, 23 }
 0x224   : > { %v1234_v39 = vand.u32 2147483647, %v1233_v45  ;;  %v1241_v16 = vsel %vm1118_vm5, %v1240_v12, %v3938_v18  ;;  %v1663_v30 = vshrl.u32 %v1658_v24, 16  ;;  %v2208_v37 = vand.u32 8388607, %v2201_v32 }
 0x225   : > { %v1672_v26 = vadd.s32 %v1671_v2, %v1661_v21  ;;  %v1670_v3 = vadd.s32 %v1666_v9, %v1662_v8  ;;  %v2524_v56 = vadd.s32 4294967169, %v2205_v10  ;;  %vm1117_vm9 = vcmp.le.f32.partialorder %v1116_v36, 0.7853982 }
 0x226   : > { %v1237_v11 = vmul.f32 %v1236_v38, %v1234_v39  ;;  %v1620_v60 = vsel %vm1614_vm13, %v1617_v58, %v1619_v43  ;;  %v1243_v4 = vsel %vm1117_vm9, 0, %v1241_v16  ;;  %v2209_v42 = vor.u32 8388608, %v2208_v37 }
 0x227   : > { %v1673_v23 = vadd.s32 %v1672_v26, %v1663_v30  ;;  %vm1676_vm10 = vc.u32 %v1651_v25, %v1670_v3  ;;  %v2211_v18 = vadd.s32 1, %v2524_v56  ;;  %v4012_v62 = vadd.f32 %v3750_v49, %v328_v27 }
 0x228   : > { %v1238_v33 = vxor.u32 2147483648, %v1237_v11  ;;  %v1674_v0 = vmul.u32 %v3959_v35, %v1620_v60  ;;  %v1260_v28 = vadd.s32 3, %v1243_v4  ;;  %v4018_v1 = vshll.u32 %v2209_v42, 8 }
 0x229   : > { %v1677_v24 = vadd.s32 1, %v1673_v23  ;;  %vm2212_vm11 = vcmp.gt.s32.totalorder %v2211_v18, 0  ;;  %v1739_v17 = vand.u32 2139095040, %v4012_v62  ;;  %v1736_v35 = vand.u32 2147483647, %v4012_v62 }
 0x22a   : > { %v1239_v20 = vsel %vm1118_vm5, %v1238_v33, %v1237_v11  ;;  %v2213_v40 = vsel %vm2212_vm11, %v2211_v18, 0  ;;  %v4021_v7 = vand.u32 3, %v1260_v28  ;;  %v4024_v13 = vadd.s32 %v1670_v3, %v1651_v25 }
 0x22b   : > { %v1242_v36 = vsel %vm1117_vm9, %v3753_v14, %v1239_v20  ;;  %v1678_v19 = vsel %vm1676_vm10, %v1677_v24, %v1673_v23  ;;  %v2215_v34 = vand.u32 31, %v2213_v40  ;;  %v4028_v6 = vand.u32 65535, %v4018_v1 }
 0x22c   : > { %v1244_v57 = vmul.f32 %v1242_v36, %v1242_v36  ;;  %v1679_v47 = vadd.s32 %v1678_v19, %v1674_v0  ;;  %v4031_v45 = vshrl.u32 %v4018_v1, 16  ;;  %v1740_v29 = vshrl.u32 %v1739_v17, 23 }
 0x22d   : > { %v2216_v9 = vsub.s32 32, %v2215_v34  ;;  %v2218_v12 = vshll.u32 %v2676_v46, %v2215_v34  ;;  %v2221_v43 = vshll.u32 %v2677_v48, %v2215_v34  ;;  %vm1266_vm12 = vcmp.eq.s32.totalorder %v4021_v7, 2 }
 0x22e   : > { %v1245_v49 = vmul.f32 -0.001358992, %v1244_v57  ;;  %v1252_v15 = vmul.f32 -0.00019511016, %v1244_v57  ;;  %v1680_v8 = vadd.s32 536870912, %v1679_v47  ;;  %vm1583_vm13 = vcmp.lt.s32.totalorder %v3778_v55, 0 }
 0x22f   : > { %v2219_v21 = vshrl.u32 %v2677_v48, %v2216_v9  ;;  %v2222_v2 = vshrl.u32 %v2678_v50, %v2216_v9  ;;  %v2227_v39 = vshll.u32 %v2679_v52, %v2215_v34  ;;  %v2228_v38 = vshrl.u32 %v2680_v54, %v2216_v9 }
 0x230   : > { %v1246_v41 = vadd.f32 0.041655596, %v1245_v49  ;;  %v1253_v31 = vadd.f32 0.008332121, %v1252_v15  ;;  %v1681_v51 = vshrl.u32 %v1680_v8, 30  ;;  %v4042_v30 = vshrl.u32 %v2213_v40, 5 }
 0x231   : > { %vm1263_vm14 = vcmp.eq.s32.totalorder %v4021_v7, 0  ;;  %v2224_v26 = vshll.u32 %v2678_v50, %v2215_v34  ;;  %v2225_v37 = vshrl.u32 %v2679_v52, %v2216_v9  ;;  %v2230_v11 = vshll.u32 %v2680_v54, %v2215_v34 }
 0x232   : > { %v1247_v22 = vmul.f32 %v1246_v41, %v1244_v57  ;;  %v1254_v61 = vmul.f32 %v1253_v31, %v1244_v57  ;;  %v1682_v58 = vshll.u32 %v1681_v51, 30  ;;  %v2231_v3 = vshrl.u32 %v2681_v63, %v2216_v9 }
 0x233   : > { %vm1262_vm15 = vcmp.lt.s32.totalorder %v4021_v7, 2  ;;  %vm1259_vm1 = vweird.f32 %v3753_v14  ;;  %v1705_v23 = vsub.s32 4, %v1681_v51  ;;  %v2220_v33 = vor.u32 %v2219_v21, %v2218_v12 }
 0x234   : > { %v1248_v25 = vadd.f32 -0.4999988, %v1247_v22  ;;  %v1255_v10 = vadd.f32 -0.16666654, %v1254_v61  ;;  %v4040_v16 = vsub.s32 %v1679_v47, %v1682_v58  ;;  %v2223_v4 = vor.u32 %v2222_v2, %v2221_v43 }
 0x235   : > { %v2229_v18 = vor.u32 %v2228_v38, %v2227_v39  ;;  %vm2233_vm2 = vcmp.lt.s32.totalorder %v4042_v30, 1  ;;  %v2226_v28 = vor.u32 %v2225_v37, %v2224_v26  ;;  %v2232_v19 = vor.u32 %v2231_v3, %v2230_v11 }
 0x236   : > { %v1249_v56 = vmul.f32 %v1248_v25, %v1244_v57  ;;  %v1256_v27 = vmul.f32 %v1255_v10, %v1244_v57  ;;  %vm1684_vm0 = vcmp.lt.s32.totalorder %v4040_v16, 0  ;;  %v1685_v60 = vsub.s32 0, %v4040_v16 }
 0x237   : > { %vm2236_vm3 = vcmp.lt.s32.totalorder %v4042_v30, 4  ;;  %vm4058_vm4 = vcmp.le.f32.partialorder %v1581_v59, 0.7853982  ;;  %vm2235_vm5 = vcmp.lt.s32.totalorder %v4042_v30, 3  ;;  %v2515_v34 = vadd.s32 4294967169, %v1740_v29 }
 0x238   : > { %v1250_v24 = vadd.f32 1.0, %v1249_v56  ;;  %v1257_v42 = vadd.f32 1.0, %v1256_v27  ;;  %v1686_v20 = vsel %vm1684_vm0, %v1685_v60, %v4040_v16  ;;  %v2217_v49 = vshrl.u32 %v2676_v46, %v2216_v9 }
 0x239   : > { %v1687_v0 = vclz %v1686_v20  ;;  %vm2234_vm6 = vcmp.lt.s32.totalorder %v4042_v30, 2  ;;  %v2241_v15 = vsel %vm2233_vm2, %v2220_v33, %v2223_v4  ;;  %v4071_v59 = vsel %vm1583_vm13, %v1705_v23, %v1681_v51 }
 0x23a   : > { %v1258_v40 = vmul.f32 %v1257_v42, %v1242_v36  ;;  %v1267_v57 = vxor.u32 2147483648, %v1250_v24  ;;  %v2242_v41 = vsel %vm2236_vm3, %v2229_v18, 920167782  ;;  %v2245_v31 = vsel %vm2233_vm2, %v2223_v4, %v2226_v28 }
 0x23b   : > { %v2513_v17 = vadd.s32 4294967294, %v1687_v0  ;;  %v2243_v9 = vsel %vm2235_vm5, %v2226_v28, %v2242_v41  ;;  %v2246_v12 = vsel %vm2236_vm3, %v2232_v19, 1326507024  ;;  %v2238_v3 = vsel %vm2236_vm3, %v2226_v28, 2102212464 }
 0x23c   : > { %v1264_v8 = vxor.u32 2147483648, %v1258_v40  ;;  %v1268_v36 = vsel %vm1266_vm12, %v1267_v57, %v1258_v40  ;;  %v2244_v51 = vsel %vm2234_vm6, %v2241_v15, %v2243_v9  ;;  %v2247_v61 = vsel %vm2235_vm5, %v2229_v18, %v2246_v12 }
 0x23d   : > { %vm2514_vm7 = vcmp.lt.s32.totalorder %v2513_v17, 0  ;;  %v2248_v38 = vsel %vm2234_vm6, %v2245_v31, %v2247_v61  ;;  %v2274_v25 = vand.u32 65535, %v2244_v51  ;;  %v2275_v10 = vshrl.u32 %v2244_v51, 16 }
 0x23e   : > { %v1265_v29 = vsel %vm1263_vm14, %v1250_v24, %v1264_v8  ;;  %v1690_v22 = vsel %vm2514_vm7, 0, %v2513_v17  ;;  %v2252_v7 = vand.u32 65535, %v2248_v38  ;;  %v2253_v56 = vshrl.u32 %v2248_v38, 16 }
 0x23f   : > { %v1269_v58 = vsel %vm1262_vm15, %v1265_v29, %v1268_v36  ;;  %v1691_v43 = vsub.s32 32, %v1690_v22  ;;  %v1692_v21 = vshll.u32 %v4040_v16, %v1690_v22  ;;  %v1695_v2 = vsub.s32 4294967266, %v1690_v22 }
 0x240   : > { %v1270_v39 = vsel %vm1259_vm1, nan, %v1269_v58  ;;  %v2277_v16 = vmul.u32 %v2275_v10, %v4028_v6  ;;  %v1746_v27 = vadd.s32 1, %v2515_v34  ;;  %v1708_v23 = vsel %vm4058_vm4, 0, %v4071_v59 }
 0x241   : > { %v2364_v26 = vmul.f32 %v3972_v44, %v1270_v39  ;;  %v1693_v37 = vshrl.u32 %v4024_v13, %v1691_v43  ;;  %v1696_v11 = vadd.s32 127, %v1695_v2  ;;  %v2278_v18 = vmul.u32 %v2274_v25, %v4031_v45 }
 0x242   : > { %v2237_v13 = vsel %vm2233_vm2, %v2217_v49, %v2220_v33  ;;  %v2255_v24 = vmul.u32 %v2253_v56, %v4028_v6  ;;  %v2256_v42 = vmul.u32 %v2252_v7, %v4031_v45  ;;  %v2280_v20 = vshll.u32 %v2277_v16, 16 }
 0x243   : > { %2377 = vst [vmem:[%s3119_s30 + $0x28] sm:$0xff] %v2364_v26  ;;  %v1694_v14 = vor.u32 %v1693_v37, %v1692_v21  ;;  %v1697_v60 = vshll.u32 %v1696_v11, 23  ;;  %v2239_v28 = vsel %vm2235_vm5, %v2223_v4, %v2238_v3  ;;  %v2254_v19 = vmul.u32 %v2252_v7, %v4028_v6 }
 0x244   : > { %v2276_v40 = vmul.u32 %v2274_v25, %v4028_v6  ;;  %v2257_v34 = vmul.u32 %v2253_v56, %v4031_v45  ;;  %v2258_v17 = vshll.u32 %v2255_v24, 16  ;;  %v2279_v15 = vmul.u32 %v2275_v10, %v4031_v45 }
 0x245   : > { %v1698_v0 = vor.u32 4788187, %v1697_v60  ;;  %v1701_v57 = vcvt.s32.f32 %v1694_v14  ;;  %v2282_v49 = vshll.u32 %v2278_v18, 16  ;;  %v2260_v36 = vshll.u32 %v2256_v42, 16 }
 0x246   : > { %vm2284_vm8 = vc.u32 %v2276_v40, %v2280_v20  ;;  %v2286_v8 = vadd.s32 %v2280_v20, %v2276_v40  ;;  %vm2262_vm9 = vc.u32 %v2254_v19, %v2258_v17  ;;  %v2264_v59 = vadd.s32 %v2258_v17, %v2254_v19 }
 0x247   : > { %v1699_v33 = vand.u32 2147483647, %v1698_v0  ;;  %v2285_v41 = vsel %vm2284_vm8, 1, %v2682_v5  ;;  %v2263_v9 = vsel %vm2262_vm9, 1, %v2682_v5  ;;  %v2281_v12 = vshrl.u32 %v2277_v16, 16 }
 0x248   : > { %v2287_v31 = vadd.s32 %v2285_v41, %v2279_v15  ;;  %vm2288_vm10 = vc.u32 %v2286_v8, %v2282_v49  ;;  %v2265_v6 = vadd.s32 %v2263_v9, %v2257_v34  ;;  %vm2266_vm11 = vc.u32 %v2264_v59, %v2260_v36 }
 0x249   : > { %v1702_v4 = vmul.f32 %v1701_v57, %v1699_v33  ;;  %v2289_v29 = vsel %vm2288_vm10, 1, %v2682_v5  ;;  %v2267_v22 = vsel %vm2266_vm11, 1, %v2682_v5  ;;  %vm1747_vm12 = vcmp.gt.s32.totalorder %v1746_v27, 0 }
 0x24a   : > { %v2291_v51 = vadd.s32 %v2289_v29, %v2287_v31  ;;  %v2240_v61 = vsel %vm2234_vm6, %v2237_v13, %v2239_v28  ;;  %v2259_v58 = vshrl.u32 %v2255_v24, 16  ;;  %v2269_v43 = vadd.s32 %v2267_v22, %v2265_v6 }
 0x24b   : > { %v1703_v45 = vxor.u32 2147483648, %v1702_v4  ;;  %v1748_v21 = vsel %vm1747_vm12, %v1746_v27, 0  ;;  %v2283_v39 = vshrl.u32 %v2278_v18, 16  ;;  %v2261_v26 = vshrl.u32 %v2256_v42, 16 }
 0x24c   : > { %v2292_v38 = vadd.s32 %v2291_v51, %v2281_v12  ;;  %v1750_v25 = vand.u32 31, %v1748_v21  ;;  %v2270_v37 = vadd.s32 %v2269_v43, %v2259_v58  ;;  %v1743_v30 = vand.u32 8388607, %v1736_v35 }
 0x24d   : > { %v1704_v2 = vsel %vm1583_vm13, %v1703_v45, %v1702_v4  ;;  %v1725_v56 = vadd.s32 3, %v1708_v23  ;;  %v4131_v27 = vadd.s32 %v2286_v8, %v2282_v49  ;;  %v2294_v14 = vmul.u32 %v4018_v1, %v2240_v61 }
 0x24e   : > { %v1707_v10 = vsel %vm4058_vm4, %v3778_v55, %v1704_v2  ;;  %v2293_v7 = vadd.s32 %v2292_v38, %v2283_v39  ;;  %v4127_v3 = vsub.s32 32, %v1750_v25  ;;  %v4129_v16 = vadd.s32 %v2270_v37, %v2261_v26 }
 0x24f   : > { %v1709_v11 = vmul.f32 %v1707_v10, %v1707_v10  ;;  %v4134_v13 = vshrl.u32 %v1748_v21, 5  ;;  %v1753_v24 = vshll.u32 %v2676_v46, %v1750_v25  ;;  %v1756_v40 = vshll.u32 %v2677_v48, %v1750_v25 }
 0x250   : > { %v2297_v47 = vadd.s32 1, %v2293_v7  ;;  %vm2296_vm13 = vc.u32 %v4129_v16, %v4131_v27  ;;  %v1754_v42 = vshrl.u32 %v2677_v48, %v4127_v3  ;;  %v1757_v23 = vshrl.u32 %v2678_v50, %v4127_v3 }
 0x251   : > { %v1710_v60 = vmul.f32 -0.001358992, %v1709_v11  ;;  %v1717_v18 = vmul.f32 -0.00019511016, %v1709_v11  ;;  %v1760_v1 = vshrl.u32 %v2679_v52, %v4127_v3  ;;  %v1762_v57 = vshll.u32 %v2679_v52, %v1750_v25 }
 0x252   : > { %v2298_v28 = vsel %vm2296_vm13, %v2297_v47, %v2293_v7  ;;  %v1763_v34 = vshrl.u32 %v2680_v54, %v4127_v3  ;;  %v4149_v33 = vor.u32 %v1754_v42, %v1753_v24  ;;  %v1759_v49 = vshll.u32 %v2678_v50, %v1750_v25 }
 0x253   : > { %v1711_v20 = vadd.f32 0.041655596, %v1710_v60  ;;  %v1718_v0 = vadd.f32 0.008332121, %v1717_v18  ;;  %v2299_v19 = vadd.s32 %v2298_v28, %v2294_v14  ;;  %v4152_v36 = vor.u32 %v1757_v23, %v1756_v40 }
 0x254   : > { %v1764_v59 = vor.u32 %v1763_v34, %v1762_v57  ;;  %v1766_v41 = vshrl.u32 %v2681_v63, %v4127_v3  ;;  %v1761_v9 = vor.u32 %v1760_v1, %v1759_v49  ;;  %v1765_v52 = vshll.u32 %v2680_v54, %v1750_v25 }
 0x255   : > { %v1712_v17 = vmul.f32 %v1711_v20, %v1709_v11  ;;  %v1719_v15 = vmul.f32 %v1718_v0, %v1709_v11  ;;  %v2300_v8 = vadd.s32 536870912, %v2299_v19  ;;  %v1726_v31 = vand.u32 3, %v1725_v56 }
 0x256   : > { %v1744_v12 = vor.u32 8388608, %v1743_v30  ;;  %v1767_v22 = vor.u32 %v1766_v41, %v1765_v52  ;;  %vm1771_vm14 = vcmp.lt.s32.totalorder %v4134_v13, 4  ;;  %vm1768_vm15 = vcmp.lt.s32.totalorder %v4134_v13, 1 }
 0x257   : > { %v1713_v4 = vadd.f32 -0.4999988, %v1712_v17  ;;  %v1720_v48 = vadd.f32 -0.16666654, %v1719_v15  ;;  %v4157_v6 = vshrl.u32 %v2300_v8, 30  ;;  %vm1770_vm0 = vcmp.lt.s32.totalorder %v4134_v13, 3 }
 0x258   : > { %v1777_v63 = vsel %vm1771_vm14, %v1764_v59, 920167782  ;;  %v1776_v61 = vsel %vm1768_vm15, %v4149_v33, %v4152_v36  ;;  %vm1727_vm1 = vcmp.lt.s32.totalorder %v1726_v31, 2  ;;  %v1780_v21 = vsel %vm1768_vm15, %v4152_v36, %v1761_v9 }
 0x259   : > { %v1714_v29 = vmul.f32 %v1713_v4, %v1709_v11  ;;  %v1721_v45 = vmul.f32 %v1720_v48, %v1709_v11  ;;  %v2302_v50 = vshll.u32 %v4157_v6, 30  ;;  %v1778_v58 = vsel %vm1770_vm0, %v1761_v9, %v1777_v63 }
 0x25a   : > { %v4174_v2 = vshll.u32 %v1744_v12, 8  ;;  %vm1769_vm2 = vcmp.lt.s32.totalorder %v4134_v13, 2  ;;  %v1781_v25 = vsel %vm1771_vm14, %v1767_v22, 1326507024  ;;  %vm1728_vm4 = vcmp.eq.s32.totalorder %v1726_v31, 0 }
 0x25b   : > { %v1715_v51 = vadd.f32 1.0, %v1714_v29  ;;  %v1722_v54 = vadd.f32 1.0, %v1721_v45  ;;  %v2303_v43 = vsub.s32 %v2299_v19, %v2302_v50  ;;  %v1779_v37 = vsel %vm1769_vm2, %v1776_v61, %v1778_v58 }
 0x25c   : > { %v1782_v11 = vsel %vm1770_vm0, %v1764_v59, %v1781_v25  ;;  %vm1731_vm5 = vcmp.eq.s32.totalorder %v1726_v31, 2  ;;  %v1785_v56 = vand.u32 65535, %v4174_v2  ;;  %v1810_v42 = vshrl.u32 %v1779_v37, 16 }
 0x25d   : > { %v1723_v39 = vmul.f32 %v1722_v54, %v1707_v10  ;;  %v1732_v38 = vxor.u32 2147483648, %v1715_v51  ;;  %vm2304_vm3 = vcmp.lt.s32.totalorder %v2303_v43, 0  ;;  %v2305_v26 = vsub.s32 0, %v2303_v43 }
 0x25e   : > { %v1783_v10 = vsel %vm1769_vm2, %v1780_v21, %v1782_v11  ;;  %vm1724_vm6 = vweird.f32 %v3778_v55  ;;  %v1786_v20 = vshrl.u32 %v4174_v2, 16  ;;  %v1809_v0 = vand.u32 65535, %v1779_v37 }
 0x25f   : > { %v1729_v7 = vxor.u32 2147483648, %v1723_v39  ;;  %v2306_v30 = vsel %vm2304_vm3, %v2305_v26, %v2303_v43  ;;  %v1787_v14 = vand.u32 65535, %v1783_v10  ;;  %v1788_v60 = vshrl.u32 %v1783_v10, 16 }
 0x260   : > { %v1733_v47 = vsel %vm1731_vm5, %v1732_v38, %v1723_v39  ;;  %v2307_v24 = vclz %v2306_v30  ;;  %v2295_v57 = vadd.s32 %v4131_v27, %v4129_v16  ;;  %v1812_v17 = vmul.u32 %v1810_v42, %v1785_v56 }
 0x261   : > { %v1730_v18 = vsel %vm1728_vm4, %v1715_v51, %v1729_v7  ;;  %v1790_v19 = vmul.u32 %v1788_v60, %v1785_v56  ;;  %v1791_v34 = vmul.u32 %v1787_v14, %v1786_v20  ;;  %v1773_v15 = vsel %vm1771_vm14, %v1761_v9, 2102212464 }
 0x262   : > { %v1734_v23 = vsel %vm1727_vm1, %v1730_v18, %v1733_v47  ;;  %v2525_v1 = vadd.s32 4294967294, %v2307_v24  ;;  %v1789_v55 = vmul.u32 %v1787_v14, %v1785_v56  ;;  %v1792_v59 = vmul.u32 %v1788_v60, %v1786_v20 }
 0x263   : > { %v1735_v28 = vsel %vm1724_vm6, nan, %v1734_v23  ;;  %v1793_v49 = vshll.u32 %v1790_v19, 16  ;;  %v1811_v41 = vmul.u32 %v1809_v0, %v1785_v56  ;;  %v1813_v4 = vmul.u32 %v1809_v0, %v1786_v20 }
 0x264   : > { %v2367_v40 = vmul.f32 %v3972_v44, %v1735_v28  ;;  %vm2526_vm7 = vcmp.lt.s32.totalorder %v2525_v1, 0  ;;  %v1795_v31 = vshll.u32 %v1791_v34, 16  ;;  %v1814_v27 = vmul.u32 %v1810_v42, %v1786_v20 }
 0x265   : > { %v2310_v8 = vsel %vm2526_vm7, 0, %v2525_v1  ;;  %vm1797_vm8 = vc.u32 %v1789_v55, %v1793_v49  ;;  %v1799_v16 = vadd.s32 %v1793_v49, %v1789_v55  ;;  %v1815_v29 = vshll.u32 %v1812_v17, 16 }
 0x266   : > { %2380 = vst [vmem:[%s3119_s30 + $0x40] sm:$0xff] %v2367_v40  ;;  %v2311_v48 = vsub.s32 32, %v2310_v8  ;;  %v2315_v52 = vsub.s32 4294967266, %v2310_v8  ;;  %v1798_v12 = vsel %vm1797_vm8, 1, %v2682_v5  ;;  %v2312_v45 = vshll.u32 %v2303_v43, %v2310_v8 }
 0x267   : > { %v1800_v9 = vadd.s32 %v1798_v12, %v1792_v59  ;;  %vm1801_vm9 = vc.u32 %v1799_v16, %v1795_v31  ;;  %v1817_v63 = vshll.u32 %v1813_v4, 16  ;;  %vm1819_vm10 = vc.u32 %v1811_v41, %v1815_v29 }
 0x268   : > { %v2313_v22 = vshrl.u32 %v2295_v57, %v2311_v48  ;;  %v2316_v50 = vadd.s32 127, %v2315_v52  ;;  %v1821_v51 = vadd.s32 %v1815_v29, %v1811_v41  ;;  %v1802_v58 = vsel %vm1801_vm9, 1, %v2682_v5 }
 0x269   : > { %v1820_v21 = vsel %vm1819_vm10, 1, %v2682_v5  ;;  %v1794_v39 = vshrl.u32 %v1790_v19, 16  ;;  %v1804_v38 = vadd.s32 %v1802_v58, %v1800_v9  ;;  %v1752_v43 = vshrl.u32 %v2676_v46, %v4127_v3 }
 0x26a   : > { %v2314_v54 = vor.u32 %v2313_v22, %v2312_v45  ;;  %v2317_v61 = vshll.u32 %v2316_v50, 23  ;;  %v1822_v25 = vadd.s32 %v1820_v21, %v1814_v27  ;;  %vm1823_vm11 = vc.u32 %v1821_v51, %v1817_v63 }
 0x26b   : > { %v1824_v37 = vsel %vm1823_vm11, 1, %v2682_v5  ;;  %v1796_v11 = vshrl.u32 %v1791_v34, 16  ;;  %v1805_v7 = vadd.s32 %v1804_v38, %v1794_v39  ;;  %v1816_v10 = vshrl.u32 %v1812_v17, 16 }
 0x26c   : > { %v2318_v26 = vor.u32 4788187, %v2317_v61  ;;  %v1826_v30 = vadd.s32 %v1824_v37, %v1822_v25  ;;  %v2321_v14 = vcvt.s32.f32 %v2314_v54  ;;  %v1772_v60 = vsel %vm1768_vm15, %v1752_v43, %v4149_v33 }
 0x26d   : > { %v1774_v18 = vsel %vm1770_vm0, %v4152_v36, %v1773_v15  ;;  %v1806_v47 = vadd.s32 %v1805_v7, %v1796_v11  ;;  %v1818_v24 = vshrl.u32 %v1813_v4, 16  ;;  %v1825_v3 = vadd.s32 %v1821_v51, %v1817_v63 }
 0x26e   : > { %v2319_v56 = vand.u32 2147483647, %v2318_v26  ;;  %v1827_v42 = vadd.s32 %v1826_v30, %v1816_v10  ;;  %v1775_v5 = vsel %vm1769_vm2, %v1772_v60, %v1774_v18  ;;  %vm2203_vm13 = vcmp.lt.s32.totalorder %v3980_v53, 0 }
 0x26f   : > { %vm1831_vm12 = vc.u32 %v1806_v47, %v1825_v3  ;;  %vm4212_vm14 = vcmp.le.f32.partialorder %v2201_v32, 0.7853982  ;;  %v1829_v28 = vmul.u32 %v4174_v2, %v1775_v5  ;;  %v2325_v1 = vsub.s32 4, %v4157_v6 }
 0x270   : > { %v2322_v46 = vmul.f32 %v2321_v14, %v2319_v56  ;;  %v1828_v23 = vadd.s32 %v1827_v42, %v1818_v24  ;;  %vm2344_vm0 = vweird.f32 %v3980_v53  ;;  %v1830_v25 = vadd.s32 %v1825_v3, %v1806_v47 }
 0x271   : > { %v2326_v32 = vsel %vm2203_vm13, %v2325_v1, %v4157_v6  ;;  %vm1738_vm5 = vcmp.lt.s32.totalorder %v4012_v62, 0  ;;  %vm1737_vm6 = vcmp.le.f32.partialorder %v1736_v35, 0.7853982  ;;  %vm1879_vm10 = vweird.f32 %v4012_v62 }
 0x272   : > { %v2323_v20 = vxor.u32 2147483648, %v2322_v46  ;;  %v1832_v0 = vadd.s32 1, %v1828_v23  ;;  %v2328_v2 = vsel %vm4212_vm14, 0, %v2326_v32 }
 0x273   : > { %v2345_v12 = vadd.s32 3, %v2328_v2 }
 0x274   : > { %v2324_v36 = vsel %vm2203_vm13, %v2323_v20, %v2322_v46  ;;  %v1833_v19 = vsel %vm1831_vm12, %v1832_v0, %v1828_v23 }
 0x275   : > { %v2327_v13 = vsel %vm4212_vm14, %v3980_v53, %v2324_v36  ;;  %v1834_v57 = vadd.s32 %v1833_v19, %v1829_v28  ;;  %v2346_v50 = vand.u32 3, %v2345_v12 }
 0x276   : > { %v2329_v40 = vmul.f32 %v2327_v13, %v2327_v13 }
 0x277   : > { %v1835_v15 = vadd.s32 536870912, %v1834_v57  ;;  %vm2348_vm1 = vcmp.eq.s32.totalorder %v2346_v50, 0  ;;  %vm2351_vm2 = vcmp.eq.s32.totalorder %v2346_v50, 2  ;;  %vm2347_vm4 = vcmp.lt.s32.totalorder %v2346_v50, 2 }
 0x278   : > { %v2330_v34 = vmul.f32 -0.001358992, %v2329_v40  ;;  %v2337_v17 = vmul.f32 -0.00019511016, %v2329_v40 }
 0x279   : > { %v1836_v8 = vshrl.u32 %v1835_v15, 30 }
 0x27a   : > { %v2331_v55 = vadd.f32 0.041655596, %v2330_v34  ;;  %v2338_v49 = vadd.f32 0.008332121, %v2337_v17 }
 0x27b   : > { %v1837_v4 = vshll.u32 %v1836_v8, 30  ;;  %v1860_v46 = vsub.s32 4, %v1836_v8 }
 0x27c   : > { %v2332_v59 = vmul.f32 %v2331_v55, %v2329_v40  ;;  %v2339_v41 = vmul.f32 %v2338_v49, %v2329_v40 }
 0x27d   : > { %v1838_v31 = vsub.s32 %v1834_v57, %v1837_v4  ;;  %v1861_v0 = vsel %vm1738_vm5, %v1860_v46, %v1836_v8 }
 0x27e   : > { %v2333_v48 = vadd.f32 -0.4999988, %v2332_v59  ;;  %v2340_v52 = vadd.f32 -0.16666654, %v2339_v41  ;;  %v1863_v28 = vsel %vm1737_vm6, 0, %v1861_v0 }
 0x27f   : > { %vm1839_vm15 = vcmp.lt.s32.totalorder %v1838_v31, 0  ;;  %v1840_v29 = vsub.s32 0, %v1838_v31  ;;  %v1880_v57 = vadd.s32 3, %v1863_v28 }
 0x280   : > { %v2334_v16 = vmul.f32 %v2333_v48, %v2329_v40  ;;  %v2341_v27 = vmul.f32 %v2340_v52, %v2329_v40 }
 0x281   : > { %v1841_v6 = vsel %vm1839_vm15, %v1840_v29, %v1838_v31  ;;  %v1881_v32 = vand.u32 3, %v1880_v57 }
 0x282   : > { %v2335_v45 = vadd.f32 1.0, %v2334_v16  ;;  %v2342_v22 = vadd.f32 1.0, %v2341_v27  ;;  %v1842_v9 = vclz %v1841_v6 }
 0x283   : > { %vm1883_vm7 = vcmp.eq.s32.totalorder %v1881_v32, 0  ;;  %vm1886_vm8 = vcmp.eq.s32.totalorder %v1881_v32, 2  ;;  %vm1882_vm9 = vcmp.lt.s32.totalorder %v1881_v32, 2 }
 0x284   : > { %v2343_v63 = vmul.f32 %v2342_v22, %v2327_v13  ;;  %v2352_v51 = vxor.u32 2147483648, %v2335_v45  ;;  %v2516_v54 = vadd.s32 4294967294, %v1842_v9 }
 0x286   : > { %v2349_v61 = vxor.u32 2147483648, %v2343_v63  ;;  %vm2517_vm3 = vcmp.lt.s32.totalorder %v2516_v54, 0  ;;  %v2353_v21 = vsel %vm2351_vm2, %v2352_v51, %v2343_v63 }
 0x287   : > { %v1845_v39 = vsel %vm2517_vm3, 0, %v2516_v54 }
 0x288   : > { %v2350_v58 = vsel %vm2348_vm1, %v2335_v45, %v2349_v61  ;;  %v1846_v26 = vsub.s32 32, %v1845_v39  ;;  %v1850_v43 = vsub.s32 4294967266, %v1845_v39  ;;  %v1847_v7 = vshll.u32 %v1838_v31, %v1845_v39 }
 0x289   : > { %v2354_v38 = vsel %vm2347_vm4, %v2350_v58, %v2353_v21 }
 0x28a   : > { %v2355_v37 = vsel %vm2344_vm0, nan, %v2354_v38  ;;  %v1848_v10 = vshrl.u32 %v1830_v25, %v1846_v26  ;;  %v1851_v30 = vadd.s32 127, %v1850_v43 }
 0x28b   : > { %v2371_v11 = vmul.f32 %v3972_v44, %v2355_v37 }
 0x28c   : > { %v1849_v53 = vor.u32 %v1848_v10, %v1847_v7  ;;  %v1852_v56 = vshll.u32 %v1851_v30, 23 }
 0x28d   : > { %2384 = vst [vmem:[%s3119_s30 + $0x60] sm:$0xff] %v2371_v11 }
 0x28e   : > { %v1853_v14 = vor.u32 4788187, %v1852_v56  ;;  %v1856_v18 = vcvt.s32.f32 %v1849_v53 }
 0x290   : > { %v1854_v60 = vand.u32 2147483647, %v1853_v14 }
 0x292   : > { %v1857_v24 = vmul.f32 %v1856_v18, %v1854_v60 }
 0x294   : > { %v1858_v42 = vxor.u32 2147483648, %v1857_v24 }
 0x296   : > { %v1859_v47 = vsel %vm1738_vm5, %v1858_v42, %v1857_v24 }
 0x297   : > { %v1862_v3 = vsel %vm1737_vm6, %v4012_v62, %v1859_v47 }
 0x298   : > { %v1864_v5 = vmul.f32 %v1862_v3, %v1862_v3 }
 0x29a   : > { %v1865_v23 = vmul.f32 -0.001358992, %v1864_v5  ;;  %v1872_v20 = vmul.f32 -0.00019511016, %v1864_v5 }
 0x29c   : > { %v1866_v33 = vadd.f32 0.041655596, %v1865_v23  ;;  %v1873_v36 = vadd.f32 0.008332121, %v1872_v20 }
 0x29e   : > { %v1867_v1 = vmul.f32 %v1866_v33, %v1864_v5  ;;  %v1874_v13 = vmul.f32 %v1873_v36, %v1864_v5 }
 0x2a0   : > { %v1868_v19 = vadd.f32 -0.4999988, %v1867_v1  ;;  %v1875_v40 = vadd.f32 -0.16666654, %v1874_v13 }
 0x2a2   : > { %v1869_v34 = vmul.f32 %v1868_v19, %v1864_v5  ;;  %v1876_v17 = vmul.f32 %v1875_v40, %v1864_v5 }
 0x2a4   : > { %v1870_v35 = vadd.f32 1.0, %v1869_v34  ;;  %v1877_v15 = vadd.f32 1.0, %v1876_v17 }
 0x2a6   : > { %v1878_v55 = vmul.f32 %v1877_v15, %v1862_v3  ;;  %v1887_v49 = vxor.u32 2147483648, %v1870_v35 }
 0x2a8   : > { %v1884_v2 = vxor.u32 2147483648, %v1878_v55  ;;  %v1888_v59 = vsel %vm1886_vm8, %v1887_v49, %v1878_v55 }
 0x2aa   : > { %v1885_v8 = vsel %vm1883_vm7, %v1870_v35, %v1884_v2 }
 0x2ab   : > { %v1889_v41 = vsel %vm1882_vm9, %v1885_v8, %v1888_v59  ;;  %2392 = sbr.rel (!%p2749_p5) target bundleno = 719 (0x2cf), region = 40 }
 0x2ac   : > { %v1890_v4 = vsel %vm1879_vm10, nan, %v1889_v41 }
 0x2ad   : > { %v2368_v48 = vmul.f32 %v3972_v44, %v1890_v4 }
 0x2af   : > { %2381 = vst [vmem:[%s3119_s30 + $0x48] sm:$0xff] %v2368_v48 }
 0x2b0   : > { %s4326_s22 = smov (!%p2395_p11, %s2394_s22), 13 }
 0x2b1   : > { %s2527_s23 = sshll.u32 %s4326_s22, 3 }
 0x2b2   : > { %s2398_s27 = ssub.s32 104, %s2527_s23 }
 0x2b3   : > { %s2399_s28 = sshll.u32 %s2398_s27, 4 }
 0x2b4   : > { %2400 = vsyncadd %s4236_s14, %s2399_s28  ;;  %p4245_p12 = scmp.ne.s32.totalorder %s2527_s23, 0  ;;  %s2534_s25 = smul.u32 104, %s2732_s19 }
 0x2b5   : > { %s2405_s29 = sshll.u32 %s3119_s30, 4  ;;  %s2531_s5 = sshll.u32 %s4326_s22, 7  ;;  %s4255_s29 = int_to_ptr.vmem [resolvable:$true] %s2405_s29 }
 0x2b6   : > { %s2403_s8 = scalar_lea.hbm %s4301_s4, %s2534_s25  ;;  %s2601_s10 = sshra.s32 %s4255_s29, 4  ;;  %s2602_s10 = int_to_ptr.vmem [resolvable:$true] %s2601_s10 }
 0x2b7   : > { %s2407_s9 = sshll.u32 %s2403_s8, 4  ;;  %s2603_s11 = sshrl.u32 %s2531_s5, 4  ;;  %s4257_s9 = int_to_ptr.hbm [resolvable:$true] %s2407_s9 }
 0x2b8   : > { %s2608_s12 = scalar_lea.vmem %s2602_s10, %s2603_s11  ;;  %s2683_s19 = smov [#allocation2]  }
 0x2b9   : > { %p2609_p13 = scmp.ne.s32.totalorder %s2602_s10, %s2608_s12  ;;  %s2612_s30 = scalar_lea.vmem %s2683_s19, 208 }
 0x2ba   : > { %p2614_p2 = scmp.lt.s32.totalorder %s2612_s30, %s2608_s12 }
 0x2bb   : > { %p2610_p0 = pnand %p2609_p13, %p4245_p12 }
 0x2bd   : > { %p2611_p1 = pneg %p2610_p0 }
 0x2bf   : > { %p2616_p3 = pnand %p2614_p2, %p2611_p1 }
 0x2c1   : > { %2619 = shalt.err (!%p2616_p3)
}
 0x2c2   : > { %s2620_s13 = sshra.s32 %s4257_s9, 4  ;;  %s2631_s25 = scalar_lea.hbm %s4301_s4, 200  ;;  %s2621_s13 = int_to_ptr.hbm [resolvable:$true] %s2620_s13 }
 0x2c3   : > { %s2627_s23 = scalar_lea.hbm %s2621_s13, %s2603_s11  ;;  %p2632_p8 = scmp.lt.s32.totalorder %s2621_s13, %s4301_s4 }
 0x2c4   : > { %p2628_p4 = scmp.ne.s32.totalorder %s2621_s13, %s2627_s23  ;;  %p2633_p9 = scmp.lt.s32.totalorder %s2631_s25, %s2627_s23 }
 0x2c6   : > { %p2629_p5 = pnand %p2628_p4, %p4245_p12  ;;  %p2634_p10 = por %p2633_p9, %p2632_p8 }
 0x2c8   : > { %p2630_p7 = pneg %p2629_p5 }
 0x2ca   : > { %p2635_p11 = pnand %p2634_p10, %p2630_p7 }
 0x2cc   : > { %2638 = shalt.err (!%p2635_p11)
}
 0x2cd   : > { %s2684_s8 = smov 128   ;;  %s2685_s10 = smov 8  }
 0x2ce   : > { %2413 = dma.vmem_to_hbm [thread:$0]  (%p4245_p12), %s4255_s29, %s2531_s5, %s4257_s9, %s4236_s14, %s2684_s8, %s2684_s8, %s2685_s10  }
 0x2cf PF: > { %p2553_p13 = scmp.ge.s32.totalorder %s2674_s18, 2  ;;  %s2422_s11 = sand.u32 1, %s2662_s15  }
 0x2d0   : > { %s2423_s12 = scalar_lea.sflag [#allocation3], %s2422_s11 }
 0x2d1   : > { %p2550_p0 = pnand %p2553_p13, %p2753_p6 }
 0x2d3   : > { %p2551_p1 = pneg %p2550_p0 }
 0x2d5   : > { %2657 = dma.done.wait (%p2551_p1), %s2423_s12, 1664  }
 0x2d6   : > { %2659 = vsyncadd (%p2551_p1), %s2423_s12, 4294965632  ;;  %p14_p2 = scmp.ge.s32.totalorder %s2736_s21, 4   ;;  %s4321_s15 = smov %s2666_s16 }
 0x2d7   : > { %s4322_s16 = smov %s2670_s17  ;;  %s4323_s17 = smov %s2747_s24 }
 0x2d8   : > { %s4324_s18 = smov %s2736_s21  ;;  %16 = sbr.rel (!%p14_p2) target bundleno = 3 (0x3), region = 71 }
 0x2dd   :  { %2429 = vsyncpa [#allocation3], 1 }
 0x2de   :  { %2431 = vsyncpa [#allocation3 + $0x1], 1 }

</bundles_post_ra>
